<compile_context>
chip_gen: v6e
topology: v6e:2x2x1
jax: 0.10.0
libtpu: 0.0.40
codegen_flags: <defaults>
</compile_context>

<pallas_src>
import jax
import jax.numpy as jnp
import numpy as np
from jax.experimental import pallas as pl
from jax.experimental.pallas import tpu as pltpu


# -----------------------------------------------------------------------------
# Host-side constant builders (static shapes; weights may be traced).
# -----------------------------------------------------------------------------
def _stacked_toeplitz(w, bn_scale, B):
    """w: (2,7,7) -> (14*B, B).  Row-block k = c*7+d holds the banded Toeplitz
    T[p,q] = w[c, d, p-q+3] * bn_scale (zero outside the band)."""
    p = np.arange(B)[:, None]
    q = np.arange(B)[None, :]
    band = p - q + 3
    valid = jnp.asarray(((band >= 0) & (band < 7)).astype(np.float32))
    t = w[:, :, np.clip(band, 0, 6)] * valid                     # (2, 7, B, B)
    t = (t * bn_scale).astype(jnp.float32)
    return t.reshape(14 * B, B)


def _stacked_toeplitz_transposed(w, bn_scale, B):
    """hc branch (computed in transposed (C,H) layout):
    row-block k = c*7+d holds T[p,q] = w[c, p-q+3, d] * bn_scale."""
    p = np.arange(B)[:, None]
    q = np.arange(B)[None, :]
    band = p - q + 3
    valid = jnp.asarray(((band >= 0) & (band < 7)).astype(np.float32))
    t = w[:, np.clip(band, 0, 6), :]                             # (2, B, B, 7)
    t = jnp.transpose(t, (0, 3, 1, 2))                           # (2, 7, B, B)
    t = (t * valid * bn_scale).astype(jnp.float32)
    return t.reshape(14 * B, B)


def _blockdiag_shift_mats(rows, nb):
    """Fallback shift operator for tiny, non-8-aligned row counts:
    S[d] (nb*rows, nb*rows) with S[d][g,g'] = 1 iff g' = g + d - 3 and both
    rows lie in the same image (zero padding at image borders)."""
    R = nb * rows
    g = np.arange(R)
    d = np.arange(7)[:, None, None]
    gi = g[None, :, None]
    gj = g[None, None, :]
    hit = (gj == gi + d - 3) & ((gi // rows) == (gj // rows))
    return jnp.asarray(hit.astype(np.float32))                   # (7, R, R)


def _pick_block_batch(N, img_bytes, target_bytes=1 << 20):
    """Images per grid step: biggest divisor of N under ~1 MiB of x, while
    keeping >= 2 grid steps when possible (v7x megacore balance)."""
    divs = [d for d in range(1, N + 1) if N % d == 0]
    ok = [d for d in divs if d * img_bytes <= target_bytes] or [1]
    ok2 = [d for d in ok if N // d >= 2]
    return max(ok2) if ok2 else max(ok)


# -----------------------------------------------------------------------------
# Fused kernel (built per static configuration).
# -----------------------------------------------------------------------------
def _make_kernel(nb, roll_h, roll_c):
    def shifted_slabs(pc, rows, use_roll, s_ref):
        """pc: (nb*rows, cols).  Returns 7 zero-padded copies shifted by d-3
        rows (d = 0..6), either via sublane rolls + iota mask or via the tiny
        block-diagonal shift-matrix fallback."""
        R, cols = pc.shape
        slabs = []
        if use_roll:
            gid = jax.lax.broadcasted_iota(jnp.int32, (R, cols), 0)
            local = gid % rows                      # row index within an image
            for d in range(7):
                if d == 3:
                    slabs.append(pc)
                    continue
                rolled = pltpu.roll(pc, shift=(3 - d) % R, axis=0)
                src = local + (d - 3)
                slabs.append(jnp.where((src >= 0) & (src < rows), rolled,
                                       jnp.float32(0.0)))
        else:
            for d in range(7):
                slabs.append(jnp.dot(s_ref[d], pc,
                                     preferred_element_type=jnp.float32))
        return slabs

    def conv7(p_max, p_mean, rows, use_roll, s_ref, t_ref, bias):
        """Zero-padded 7x7 cross-correlation (2 -> 1 channels) + folded BN for
        nb stacked maps as ONE MXU matmul with K = 14*cols."""
        cols = p_max.shape[-1]
        pm = p_max.reshape(nb * rows, cols)
        pa = p_mean.reshape(nb * rows, cols)
        slabs = (shifted_slabs(pm, rows, use_roll, s_ref)
                 + shifted_slabs(pa, rows, use_roll, s_ref))
        lhs = jnp.concatenate(slabs, axis=-1)            # (nb*rows, 14*cols)
        out = jnp.dot(lhs, t_ref[...], preferred_element_type=jnp.float32)
        return jax.nn.sigmoid(out + bias).reshape(nb, rows, cols)

    def kernel(*refs):
        bn_ref, x_ref, t_hw_ref, t_cw_ref, t_hc_ref = refs[:5]
        k = 5
        s_h_ref = None
        s_c_ref = None
        if not roll_h:
            s_h_ref = refs[k]
            k += 1
        if not roll_c:
            s_c_ref = refs[k]
            k += 1
        o_ref = refs[k]

        x = x_ref[...].astype(jnp.float32)               # (nb, C, H, W)
        _, C, H, W = x.shape

        # ZPool (max, mean) along each branch's reduced axis, natural layouts.
        hw_mx = jnp.max(x, axis=1)
        hw_mn = jnp.sum(x, axis=1) * (1.0 / C)           # (nb, H, W)
        cw_mx = jnp.max(x, axis=2)
        cw_mn = jnp.sum(x, axis=2) * (1.0 / H)           # (nb, C, W)
        hc_mx = jnp.max(x, axis=3)
        hc_mn = jnp.sum(x, axis=3) * (1.0 / W)           # (nb, C, H)

        g_hw = conv7(hw_mx, hw_mn, H, roll_h, s_h_ref, t_hw_ref, bn_ref[0])
        g_cw = conv7(cw_mx, cw_mn, C, roll_c, s_c_ref, t_cw_ref, bn_ref[1])
        g_hc = conv7(hc_mx, hc_mn, C, roll_c, s_c_ref, t_hc_ref, bn_ref[2])

        # TODO(synk): g_hc's trailing broadcast moves H from lanes to sublanes;
        #             an explicit small vxpose may be cheaper (verify in the
        #             bundle dump: vxpose vs gather).
        gate = (g_hw[:, None, :, :] + g_cw[:, :, None, :] +
                g_hc[:, :, :, None]) * jnp.float32(1.0 / 3.0)
        o_ref[...] = (x * gate).astype(o_ref.dtype)

    return kernel


def _fused_call(x, bn_vec, t_hw, t_cw, t_hc, shift_extras, nb, roll_h, roll_c):
    N, C, H, W = x.shape
    grid = N // nb
    x_blk = pl.BlockSpec((nb, C, H, W), lambda n: (n, 0, 0, 0))

    def const_spec(arr):
        nd = arr.ndim
        return pl.BlockSpec(arr.shape, lambda n, _nd=nd: (0,) * _nd)

    consts = [t_hw, t_cw, t_hc] + list(shift_extras)
    in_specs = ([pl.BlockSpec(memory_space=pltpu.MemorySpace.SMEM), x_blk]
                + [const_spec(c) for c in consts])

    const_bytes = 4 * sum(int(np.prod(c.shape)) for c in consts)
    blk_bytes = nb * C * H * W * 4
    vmem_limit = int(min(64 * 2**20,
                         max(32 * 2**20, 12 * blk_bytes + 2 * const_bytes)))

    cost = pl.CostEstimate(
        flops=2 * N * 14 * (H * W * W + C * W * W + C * H * H)
        + 8 * N * C * H * W,
        transcendentals=N * (H * W + C * W + C * H),
        bytes_accessed=2 * N * C * H * W * x.dtype.itemsize + const_bytes,
    )

    return pl.pallas_call(
        _make_kernel(nb, roll_h, roll_c),
        out_shape=jax.ShapeDtypeStruct((N, C, H, W), x.dtype),
        grid_spec=pltpu.PrefetchScalarGridSpec(
            num_scalar_prefetch=0,
            grid=(grid,),
            in_specs=in_specs,
            out_specs=x_blk,
        ),
        compiler_params=pltpu.CompilerParams(
            dimension_semantics=("parallel",),
            vmem_limit_bytes=vmem_limit),
        cost_estimate=cost,
    )(bn_vec, x, *consts)


# -----------------------------------------------------------------------------
# TripletAttention forward (x in NCHW, matching the PyTorch module)
# -----------------------------------------------------------------------------
@jax.jit
def triplet_attention(x, params):
    (w_cw, s_cw, b_cw), (w_hc, s_hc, b_hc), (w_hw, s_hw, b_hw) = params
    N, C, H, W = x.shape

    nb = _pick_block_batch(N, C * H * W * 4)
    roll_h = (nb * H) % 8 == 0
    roll_c = (nb * C) % 8 == 0

    t_hw = _stacked_toeplitz(w_hw[0], s_hw, W)                 # (14W, W)
    t_cw = _stacked_toeplitz(w_cw[0], s_cw, W)                 # (14W, W)
    t_hc = _stacked_toeplitz_transposed(w_hc[0], s_hc, H)      # (14H, H)
    bn_vec = jnp.stack([b_hw, b_cw, b_hc]).astype(jnp.float32)

    extras = []
    if not roll_h:
        extras.append(_blockdiag_shift_mats(H, nb))
    if not roll_c:
        extras.append(_blockdiag_shift_mats(C, nb))

    return _fused_call(x, bn_vec, t_hw, t_cw, t_hc, extras, nb, roll_h, roll_c)


# -----------------------------------------------------------------------------
# Deterministic parameter init (BasicConv(2, 1, 7) + BatchNorm2d(1), eval mode)
# -----------------------------------------------------------------------------
def init_gate(key):
    kw, kg, kb, km, kv = jax.random.split(key, 5)
    w = jax.random.normal(kw, (1, 2, 7, 7), jnp.float32) * 0.1
    gamma = 1.0 + 0.05 * jax.random.normal(kg, (), jnp.float32)
    beta = 0.05 * jax.random.normal(kb, (), jnp.float32)
    r_mean = 0.05 * jax.random.normal(km, (), jnp.float32)
    r_var = jnp.abs(1.0 + 0.05 * jax.random.normal(kv, (), jnp.float32))
    scale = gamma / jnp.sqrt(r_var + 1e-5)
    bias = beta - r_mean * scale
    return w, scale, bias


# -----------------------------------------------------------------------------
# Pure-JAX reference (for correctness check)
# -----------------------------------------------------------------------------
def _gate_ref(x, w, s, b):
    mx = jnp.max(x, axis=1, keepdims=True)
    mn = jnp.mean(x, axis=1, keepdims=True)
    comp = jnp.concatenate([mx, mn], axis=1)
    conv = jax.lax.conv_general_dilated(
        comp, w, window_strides=(1, 1), padding=((3, 3), (3, 3)),
        dimension_numbers=("NCHW", "OIHW", "NCHW"))
    return x * jax.nn.sigmoid(conv * s + b)


def _triplet_ref(x, params):
    (w_cw, s_cw, b_cw), (w_hc, s_hc, b_hc), (w_hw, s_hw, b_hw) = params
    xp1 = jnp.transpose(x, (0, 2, 1, 3))
    o1 = jnp.transpose(_gate_ref(xp1, w_cw, s_cw, b_cw), (0, 2, 1, 3))
    xp2 = jnp.transpose(x, (0, 3, 2, 1))
    o2 = jnp.transpose(_gate_ref(xp2, w_hc, s_hc, b_hc), (0, 3, 2, 1))
    o3 = _gate_ref(x, w_hw, s_hw, b_hw)
    return (1.0 / 3.0) * (o3 + o1 + o2)


if __name__ == "__main__":
    key = jax.random.PRNGKey(0)
    kx, k1, k2, k3 = jax.random.split(key, 4)

    x = jax.random.normal(kx, (2, 4, 16, 16), jnp.float32)   # NCHW
    params = (init_gate(k1), init_gate(k2), init_gate(k3))   # (cw, hc, hw)

    out = jax.block_until_ready(triplet_attention(x, params))

    ref = _triplet_ref(x, params)
    np.testing.assert_allclose(np.asarray(out), np.asarray(ref),
                               rtol=1e-4, atol=1e-4)
    print("KERNEL_OK")
</pallas_src>

<mosaic_0001>
module attributes {stable_mosaic.version = 11 : i64} {
  func.func @kernel(%arg0: i32, %arg1: memref<3xf32, #tpu.memory_space<smem>>, %arg2: memref<1x4x16x16xf32, #tpu.memory_space<vmem>>, %arg3: memref<224x16xf32, #tpu.memory_space<vmem>>, %arg4: memref<224x16xf32, #tpu.memory_space<vmem>>, %arg5: memref<224x16xf32, #tpu.memory_space<vmem>>, %arg6: memref<7x4x4xf32, #tpu.memory_space<vmem>>, %arg7: memref<1x4x16x16xf32, #tpu.memory_space<vmem>>) attributes {dimension_semantics = [#tpu.dimension_semantics<parallel>], iteration_bounds = array<i64: 2>, scalar_prefetch = 0 : i64, scratch_operands = 0 : i64, tpu.core_type = #tpu.core_type<tc>, window_params = [{transform_indices = @transform_0, window_bounds = array<i64: 3>}, {transform_indices = @transform_1, window_bounds = array<i64: 1, 4, 16, 16>}, {pipeline_mode = #tpu.pipeline_mode<synchronous>, transform_indices = @transform_2, window_bounds = array<i64: 224, 16>}, {pipeline_mode = #tpu.pipeline_mode<synchronous>, transform_indices = @transform_3, window_bounds = array<i64: 224, 16>}, {pipeline_mode = #tpu.pipeline_mode<synchronous>, transform_indices = @transform_4, window_bounds = array<i64: 224, 16>}, {pipeline_mode = #tpu.pipeline_mode<synchronous>, transform_indices = @transform_5, window_bounds = array<i64: 7, 4, 4>}, {transform_indices = @transform_6, window_bounds = array<i64: 1, 4, 16, 16>}]} {
    %c0 = arith.constant 0 : index
    %c0_0 = arith.constant 0 : index
    %c0_1 = arith.constant 0 : index
    %c0_2 = arith.constant 0 : index
    %0 = vector.load %arg2[%c0, %c0_0, %c0_1, %c0_2] : memref<1x4x16x16xf32, #tpu.memory_space<vmem>>, vector<1x4x16x16xf32>
    %cst = arith.constant dense<0xFF800000> : vector<1x16x16xf32>
    %1 = vector.multi_reduction <maximumf>, %0, %cst [1] : vector<1x4x16x16xf32> to vector<1x16x16xf32>
    %cst_3 = arith.constant dense<0.000000e+00> : vector<1x16x16xf32>
    %2 = vector.multi_reduction <add>, %0, %cst_3 [1] : vector<1x4x16x16xf32> to vector<1x16x16xf32>
    %cst_4 = arith.constant 2.500000e-01 : f32
    %3 = vector.broadcast %cst_4 : f32 to vector<1x16x16xf32>
    %4 = arith.mulf %2, %3 : vector<1x16x16xf32>
    %cst_5 = arith.constant dense<0xFF800000> : vector<1x4x16xf32>
    %5 = vector.multi_reduction <maximumf>, %0, %cst_5 [2] : vector<1x4x16x16xf32> to vector<1x4x16xf32>
    %cst_6 = arith.constant dense<0.000000e+00> : vector<1x4x16xf32>
    %6 = vector.multi_reduction <add>, %0, %cst_6 [2] : vector<1x4x16x16xf32> to vector<1x4x16xf32>
    %cst_7 = arith.constant 6.250000e-02 : f32
    %7 = vector.broadcast %cst_7 : f32 to vector<1x4x16xf32>
    %8 = arith.mulf %6, %7 : vector<1x4x16xf32>
    %cst_8 = arith.constant dense<0xFF800000> : vector<1x4x16xf32>
    %9 = vector.multi_reduction <maximumf>, %0, %cst_8 [3] : vector<1x4x16x16xf32> to vector<1x4x16xf32>
    %cst_9 = arith.constant dense<0.000000e+00> : vector<1x4x16xf32>
    %10 = vector.multi_reduction <add>, %0, %cst_9 [3] : vector<1x4x16x16xf32> to vector<1x4x16xf32>
    %cst_10 = arith.constant 6.250000e-02 : f32
    %11 = vector.broadcast %cst_10 : f32 to vector<1x4x16xf32>
    %12 = arith.mulf %10, %11 : vector<1x4x16xf32>
    %c0_11 = arith.constant 0 : index
    %13 = memref.load %arg1[%c0_11] : memref<3xf32, #tpu.memory_space<smem>>
    %14 = vector.shape_cast %1 : vector<1x16x16xf32> to vector<16x16xf32>
    %15 = vector.shape_cast %4 : vector<1x16x16xf32> to vector<16x16xf32>
    %16 = tpu.iota {dimensions = array<i32: 0>} : vector<16x16xi32>
    %c16_i32 = arith.constant 16 : i32
    %c0_i32 = arith.constant 0 : i32
    %17 = arith.cmpi eq, %c16_i32, %c0_i32 : i32
    %c1_i32 = arith.constant 1 : i32
    %18 = arith.select %17, %c1_i32, %c16_i32 : i32
    %19 = vector.broadcast %18 : i32 to vector<16x16xi32>
    %20 = arith.remsi %16, %19 : vector<16x16xi32>
    %c0_i32_12 = arith.constant 0 : i32
    %21 = vector.broadcast %c0_i32_12 : i32 to vector<16x16xi32>
    %22 = arith.cmpi ne, %20, %21 : vector<16x16xi32>
    %c0_i32_13 = arith.constant 0 : i32
    %23 = vector.broadcast %c0_i32_13 : i32 to vector<16x16xi32>
    %24 = arith.cmpi slt, %20, %23 : vector<16x16xi32>
    %c0_i32_14 = arith.constant 0 : i32
    %25 = arith.cmpi slt, %18, %c0_i32_14 : i32
    %26 = vector.broadcast %25 : i1 to vector<16x16xi1>
    %27 = vector.broadcast %26 : vector<16x16xi1> to vector<16x16xi1>
    %28 = arith.xori %24, %27 : vector<16x16xi1>
    %29 = arith.andi %28, %22 : vector<16x16xi1>
    %30 = vector.broadcast %18 : i32 to vector<16x16xi32>
    %31 = arith.addi %20, %30 : vector<16x16xi32>
    %32 = arith.select %29, %31, %20 : vector<16x16xi1>, vector<16x16xi32>
    %c3_i32 = arith.constant 3 : i32
    %33 = tpu.dynamic_rotate %14 by %c3_i32 dim 0 : vector<16x16xf32>, i32 -> vector<16x16xf32>
    %c-3_i32 = arith.constant -3 : i32
    %34 = vector.broadcast %c-3_i32 : i32 to vector<16x16xi32>
    %35 = arith.addi %32, %34 : vector<16x16xi32>
    %c0_i32_15 = arith.constant 0 : i32
    %36 = vector.broadcast %c0_i32_15 : i32 to vector<16x16xi32>
    %37 = arith.cmpi sge, %35, %36 : vector<16x16xi32>
    %c16_i32_16 = arith.constant 16 : i32
    %38 = vector.broadcast %c16_i32_16 : i32 to vector<16x16xi32>
    %39 = arith.cmpi slt, %35, %38 : vector<16x16xi32>
    %40 = arith.andi %37, %39 : vector<16x16xi1>
    %cst_17 = arith.constant 0.000000e+00 : f32
    %41 = vector.broadcast %cst_17 : f32 to vector<16x16xf32>
    %42 = arith.select %40, %33, %41 : vector<16x16xi1>, vector<16x16xf32>
    %c2_i32 = arith.constant 2 : i32
    %43 = tpu.dynamic_rotate %14 by %c2_i32 dim 0 : vector<16x16xf32>, i32 -> vector<16x16xf32>
    %c-2_i32 = arith.constant -2 : i32
    %44 = vector.broadcast %c-2_i32 : i32 to vector<16x16xi32>
    %45 = arith.addi %32, %44 : vector<16x16xi32>
    %c0_i32_18 = arith.constant 0 : i32
    %46 = vector.broadcast %c0_i32_18 : i32 to vector<16x16xi32>
    %47 = arith.cmpi sge, %45, %46 : vector<16x16xi32>
    %c16_i32_19 = arith.constant 16 : i32
    %48 = vector.broadcast %c16_i32_19 : i32 to vector<16x16xi32>
    %49 = arith.cmpi slt, %45, %48 : vector<16x16xi32>
    %50 = arith.andi %47, %49 : vector<16x16xi1>
    %cst_20 = arith.constant 0.000000e+00 : f32
    %51 = vector.broadcast %cst_20 : f32 to vector<16x16xf32>
    %52 = arith.select %50, %43, %51 : vector<16x16xi1>, vector<16x16xf32>
    %c1_i32_21 = arith.constant 1 : i32
    %53 = tpu.dynamic_rotate %14 by %c1_i32_21 dim 0 : vector<16x16xf32>, i32 -> vector<16x16xf32>
    %c-1_i32 = arith.constant -1 : i32
    %54 = vector.broadcast %c-1_i32 : i32 to vector<16x16xi32>
    %55 = arith.addi %32, %54 : vector<16x16xi32>
    %c0_i32_22 = arith.constant 0 : i32
    %56 = vector.broadcast %c0_i32_22 : i32 to vector<16x16xi32>
    %57 = arith.cmpi sge, %55, %56 : vector<16x16xi32>
    %c16_i32_23 = arith.constant 16 : i32
    %58 = vector.broadcast %c16_i32_23 : i32 to vector<16x16xi32>
    %59 = arith.cmpi slt, %55, %58 : vector<16x16xi32>
    %60 = arith.andi %57, %59 : vector<16x16xi1>
    %cst_24 = arith.constant 0.000000e+00 : f32
    %61 = vector.broadcast %cst_24 : f32 to vector<16x16xf32>
    %62 = arith.select %60, %53, %61 : vector<16x16xi1>, vector<16x16xf32>
    %c15_i32 = arith.constant 15 : i32
    %63 = tpu.dynamic_rotate %14 by %c15_i32 dim 0 : vector<16x16xf32>, i32 -> vector<16x16xf32>
    %c1_i32_25 = arith.constant 1 : i32
    %64 = vector.broadcast %c1_i32_25 : i32 to vector<16x16xi32>
    %65 = arith.addi %32, %64 : vector<16x16xi32>
    %c0_i32_26 = arith.constant 0 : i32
    %66 = vector.broadcast %c0_i32_26 : i32 to vector<16x16xi32>
    %67 = arith.cmpi sge, %65, %66 : vector<16x16xi32>
    %c16_i32_27 = arith.constant 16 : i32
    %68 = vector.broadcast %c16_i32_27 : i32 to vector<16x16xi32>
    %69 = arith.cmpi slt, %65, %68 : vector<16x16xi32>
    %70 = arith.andi %67, %69 : vector<16x16xi1>
    %cst_28 = arith.constant 0.000000e+00 : f32
    %71 = vector.broadcast %cst_28 : f32 to vector<16x16xf32>
    %72 = arith.select %70, %63, %71 : vector<16x16xi1>, vector<16x16xf32>
    %c14_i32 = arith.constant 14 : i32
    %73 = tpu.dynamic_rotate %14 by %c14_i32 dim 0 : vector<16x16xf32>, i32 -> vector<16x16xf32>
    %c2_i32_29 = arith.constant 2 : i32
    %74 = vector.broadcast %c2_i32_29 : i32 to vector<16x16xi32>
    %75 = arith.addi %32, %74 : vector<16x16xi32>
    %c0_i32_30 = arith.constant 0 : i32
    %76 = vector.broadcast %c0_i32_30 : i32 to vector<16x16xi32>
    %77 = arith.cmpi sge, %75, %76 : vector<16x16xi32>
    %c16_i32_31 = arith.constant 16 : i32
    %78 = vector.broadcast %c16_i32_31 : i32 to vector<16x16xi32>
    %79 = arith.cmpi slt, %75, %78 : vector<16x16xi32>
    %80 = arith.andi %77, %79 : vector<16x16xi1>
    %cst_32 = arith.constant 0.000000e+00 : f32
    %81 = vector.broadcast %cst_32 : f32 to vector<16x16xf32>
    %82 = arith.select %80, %73, %81 : vector<16x16xi1>, vector<16x16xf32>
    %c13_i32 = arith.constant 13 : i32
    %83 = tpu.dynamic_rotate %14 by %c13_i32 dim 0 : vector<16x16xf32>, i32 -> vector<16x16xf32>
    %c3_i32_33 = arith.constant 3 : i32
    %84 = vector.broadcast %c3_i32_33 : i32 to vector<16x16xi32>
    %85 = arith.addi %32, %84 : vector<16x16xi32>
    %c0_i32_34 = arith.constant 0 : i32
    %86 = vector.broadcast %c0_i32_34 : i32 to vector<16x16xi32>
    %87 = arith.cmpi sge, %85, %86 : vector<16x16xi32>
    %c16_i32_35 = arith.constant 16 : i32
    %88 = vector.broadcast %c16_i32_35 : i32 to vector<16x16xi32>
    %89 = arith.cmpi slt, %85, %88 : vector<16x16xi32>
    %90 = arith.andi %87, %89 : vector<16x16xi1>
    %cst_36 = arith.constant 0.000000e+00 : f32
    %91 = vector.broadcast %cst_36 : f32 to vector<16x16xf32>
    %92 = arith.select %90, %83, %91 : vector<16x16xi1>, vector<16x16xf32>
    %93 = tpu.iota {dimensions = array<i32: 0>} : vector<16x16xi32>
    %c16_i32_37 = arith.constant 16 : i32
    %c0_i32_38 = arith.constant 0 : i32
    %94 = arith.cmpi eq, %c16_i32_37, %c0_i32_38 : i32
    %c1_i32_39 = arith.constant 1 : i32
    %95 = arith.select %94, %c1_i32_39, %c16_i32_37 : i32
    %96 = vector.broadcast %95 : i32 to vector<16x16xi32>
    %97 = arith.remsi %93, %96 : vector<16x16xi32>
    %c0_i32_40 = arith.constant 0 : i32
    %98 = vector.broadcast %c0_i32_40 : i32 to vector<16x16xi32>
    %99 = arith.cmpi ne, %97, %98 : vector<16x16xi32>
    %c0_i32_41 = arith.constant 0 : i32
    %100 = vector.broadcast %c0_i32_41 : i32 to vector<16x16xi32>
    %101 = arith.cmpi slt, %97, %100 : vector<16x16xi32>
    %c0_i32_42 = arith.constant 0 : i32
    %102 = arith.cmpi slt, %95, %c0_i32_42 : i32
    %103 = vector.broadcast %102 : i1 to vector<16x16xi1>
    %104 = vector.broadcast %103 : vector<16x16xi1> to vector<16x16xi1>
    %105 = arith.xori %101, %104 : vector<16x16xi1>
    %106 = arith.andi %105, %99 : vector<16x16xi1>
    %107 = vector.broadcast %95 : i32 to vector<16x16xi32>
    %108 = arith.addi %97, %107 : vector<16x16xi32>
    %109 = arith.select %106, %108, %97 : vector<16x16xi1>, vector<16x16xi32>
    %c3_i32_43 = arith.constant 3 : i32
    %110 = tpu.dynamic_rotate %15 by %c3_i32_43 dim 0 : vector<16x16xf32>, i32 -> vector<16x16xf32>
    %c-3_i32_44 = arith.constant -3 : i32
    %111 = vector.broadcast %c-3_i32_44 : i32 to vector<16x16xi32>
    %112 = arith.addi %109, %111 : vector<16x16xi32>
    %c0_i32_45 = arith.constant 0 : i32
    %113 = vector.broadcast %c0_i32_45 : i32 to vector<16x16xi32>
    %114 = arith.cmpi sge, %112, %113 : vector<16x16xi32>
    %c16_i32_46 = arith.constant 16 : i32
    %115 = vector.broadcast %c16_i32_46 : i32 to vector<16x16xi32>
    %116 = arith.cmpi slt, %112, %115 : vector<16x16xi32>
    %117 = arith.andi %114, %116 : vector<16x16xi1>
    %cst_47 = arith.constant 0.000000e+00 : f32
    %118 = vector.broadcast %cst_47 : f32 to vector<16x16xf32>
    %119 = arith.select %117, %110, %118 : vector<16x16xi1>, vector<16x16xf32>
    %c2_i32_48 = arith.constant 2 : i32
    %120 = tpu.dynamic_rotate %15 by %c2_i32_48 dim 0 : vector<16x16xf32>, i32 -> vector<16x16xf32>
    %c-2_i32_49 = arith.constant -2 : i32
    %121 = vector.broadcast %c-2_i32_49 : i32 to vector<16x16xi32>
    %122 = arith.addi %109, %121 : vector<16x16xi32>
    %c0_i32_50 = arith.constant 0 : i32
    %123 = vector.broadcast %c0_i32_50 : i32 to vector<16x16xi32>
    %124 = arith.cmpi sge, %122, %123 : vector<16x16xi32>
    %c16_i32_51 = arith.constant 16 : i32
    %125 = vector.broadcast %c16_i32_51 : i32 to vector<16x16xi32>
    %126 = arith.cmpi slt, %122, %125 : vector<16x16xi32>
    %127 = arith.andi %124, %126 : vector<16x16xi1>
    %cst_52 = arith.constant 0.000000e+00 : f32
    %128 = vector.broadcast %cst_52 : f32 to vector<16x16xf32>
    %129 = arith.select %127, %120, %128 : vector<16x16xi1>, vector<16x16xf32>
    %c1_i32_53 = arith.constant 1 : i32
    %130 = tpu.dynamic_rotate %15 by %c1_i32_53 dim 0 : vector<16x16xf32>, i32 -> vector<16x16xf32>
    %c-1_i32_54 = arith.constant -1 : i32
    %131 = vector.broadcast %c-1_i32_54 : i32 to vector<16x16xi32>
    %132 = arith.addi %109, %131 : vector<16x16xi32>
    %c0_i32_55 = arith.constant 0 : i32
    %133 = vector.broadcast %c0_i32_55 : i32 to vector<16x16xi32>
    %134 = arith.cmpi sge, %132, %133 : vector<16x16xi32>
    %c16_i32_56 = arith.constant 16 : i32
    %135 = vector.broadcast %c16_i32_56 : i32 to vector<16x16xi32>
    %136 = arith.cmpi slt, %132, %135 : vector<16x16xi32>
    %137 = arith.andi %134, %136 : vector<16x16xi1>
    %cst_57 = arith.constant 0.000000e+00 : f32
    %138 = vector.broadcast %cst_57 : f32 to vector<16x16xf32>
    %139 = arith.select %137, %130, %138 : vector<16x16xi1>, vector<16x16xf32>
    %c15_i32_58 = arith.constant 15 : i32
    %140 = tpu.dynamic_rotate %15 by %c15_i32_58 dim 0 : vector<16x16xf32>, i32 -> vector<16x16xf32>
    %c1_i32_59 = arith.constant 1 : i32
    %141 = vector.broadcast %c1_i32_59 : i32 to vector<16x16xi32>
    %142 = arith.addi %109, %141 : vector<16x16xi32>
    %c0_i32_60 = arith.constant 0 : i32
    %143 = vector.broadcast %c0_i32_60 : i32 to vector<16x16xi32>
    %144 = arith.cmpi sge, %142, %143 : vector<16x16xi32>
    %c16_i32_61 = arith.constant 16 : i32
    %145 = vector.broadcast %c16_i32_61 : i32 to vector<16x16xi32>
    %146 = arith.cmpi slt, %142, %145 : vector<16x16xi32>
    %147 = arith.andi %144, %146 : vector<16x16xi1>
    %cst_62 = arith.constant 0.000000e+00 : f32
    %148 = vector.broadcast %cst_62 : f32 to vector<16x16xf32>
    %149 = arith.select %147, %140, %148 : vector<16x16xi1>, vector<16x16xf32>
    %c14_i32_63 = arith.constant 14 : i32
    %150 = tpu.dynamic_rotate %15 by %c14_i32_63 dim 0 : vector<16x16xf32>, i32 -> vector<16x16xf32>
    %c2_i32_64 = arith.constant 2 : i32
    %151 = vector.broadcast %c2_i32_64 : i32 to vector<16x16xi32>
    %152 = arith.addi %109, %151 : vector<16x16xi32>
    %c0_i32_65 = arith.constant 0 : i32
    %153 = vector.broadcast %c0_i32_65 : i32 to vector<16x16xi32>
    %154 = arith.cmpi sge, %152, %153 : vector<16x16xi32>
    %c16_i32_66 = arith.constant 16 : i32
    %155 = vector.broadcast %c16_i32_66 : i32 to vector<16x16xi32>
    %156 = arith.cmpi slt, %152, %155 : vector<16x16xi32>
    %157 = arith.andi %154, %156 : vector<16x16xi1>
    %cst_67 = arith.constant 0.000000e+00 : f32
    %158 = vector.broadcast %cst_67 : f32 to vector<16x16xf32>
    %159 = arith.select %157, %150, %158 : vector<16x16xi1>, vector<16x16xf32>
    %c13_i32_68 = arith.constant 13 : i32
    %160 = tpu.dynamic_rotate %15 by %c13_i32_68 dim 0 : vector<16x16xf32>, i32 -> vector<16x16xf32>
    %c3_i32_69 = arith.constant 3 : i32
    %161 = vector.broadcast %c3_i32_69 : i32 to vector<16x16xi32>
    %162 = arith.addi %109, %161 : vector<16x16xi32>
    %c0_i32_70 = arith.constant 0 : i32
    %163 = vector.broadcast %c0_i32_70 : i32 to vector<16x16xi32>
    %164 = arith.cmpi sge, %162, %163 : vector<16x16xi32>
    %c16_i32_71 = arith.constant 16 : i32
    %165 = vector.broadcast %c16_i32_71 : i32 to vector<16x16xi32>
    %166 = arith.cmpi slt, %162, %165 : vector<16x16xi32>
    %167 = arith.andi %164, %166 : vector<16x16xi1>
    %cst_72 = arith.constant 0.000000e+00 : f32
    %168 = vector.broadcast %cst_72 : f32 to vector<16x16xf32>
    %169 = arith.select %167, %160, %168 : vector<16x16xi1>, vector<16x16xf32>
    %170 = tpu.concatenate %42, %52, %62, %14, %72, %82, %92, %119, %129, %139, %15, %149, %159, %169 in 1 : vector<16x16xf32>, vector<16x16xf32>, vector<16x16xf32>, vector<16x16xf32>, vector<16x16xf32>, vector<16x16xf32>, vector<16x16xf32>, vector<16x16xf32>, vector<16x16xf32>, vector<16x16xf32>, vector<16x16xf32>, vector<16x16xf32>, vector<16x16xf32>, vector<16x16xf32> -> vector<16x224xf32>
    %c0_73 = arith.constant 0 : index
    %c0_74 = arith.constant 0 : index
    %171 = vector.load %arg3[%c0_73, %c0_74] : memref<224x16xf32, #tpu.memory_space<vmem>>, vector<224x16xf32>
    %cst_75 = arith.constant dense<0.000000e+00> : vector<16x16xf32>
    %172 = tpu.matmul %170, %171, %cst_75 {dimension_numbers = #tpu.dot_dimension_numbers<[1], [0], [0], [1], [0, 0, 1, 1], [], []>} : vector<16x224xf32>, vector<224x16xf32>, vector<16x16xf32> -> vector<16x16xf32>
    %173 = vector.broadcast %13 : f32 to vector<16x16xf32>
    %174 = arith.addf %172, %173 : vector<16x16xf32>
    %175 = arith.negf %174 : vector<16x16xf32>
    %176 = math.exp %175 : vector<16x16xf32>
    %cst_76 = arith.constant 1.000000e+00 : f32
    %177 = vector.broadcast %cst_76 : f32 to vector<16x16xf32>
    %178 = arith.addf %177, %176 : vector<16x16xf32>
    %179 = arith.divf %177, %178 : vector<16x16xf32>
    %180 = vector.shape_cast %179 : vector<16x16xf32> to vector<1x16x16xf32>
    %c1 = arith.constant 1 : index
    %181 = memref.load %arg1[%c1] : memref<3xf32, #tpu.memory_space<smem>>
    %182 = vector.shape_cast %5 : vector<1x4x16xf32> to vector<4x16xf32>
    %183 = vector.shape_cast %8 : vector<1x4x16xf32> to vector<4x16xf32>
    %c0_77 = arith.constant 0 : index
    %c0_78 = arith.constant 0 : index
    %c0_79 = arith.constant 0 : index
    %184 = vector.load %arg6[%c0_77, %c0_78, %c0_79] : memref<7x4x4xf32, #tpu.memory_space<vmem>>, vector<1x4x4xf32>
    %185 = vector.shape_cast %184 : vector<1x4x4xf32> to vector<4x4xf32>
    %cst_80 = arith.constant dense<0.000000e+00> : vector<4x16xf32>
    %186 = tpu.matmul %185, %182, %cst_80 {dimension_numbers = #tpu.dot_dimension_numbers<[1], [0], [0], [1], [0, 0, 1, 1], [], []>} : vector<4x4xf32>, vector<4x16xf32>, vector<4x16xf32> -> vector<4x16xf32>
    %c1_81 = arith.constant 1 : index
    %c0_82 = arith.constant 0 : index
    %c0_83 = arith.constant 0 : index
    %187 = vector.load %arg6[%c1_81, %c0_82, %c0_83] : memref<7x4x4xf32, #tpu.memory_space<vmem>>, vector<1x4x4xf32>
    %188 = vector.shape_cast %187 : vector<1x4x4xf32> to vector<4x4xf32>
    %cst_84 = arith.constant dense<0.000000e+00> : vector<4x16xf32>
    %189 = tpu.matmul %188, %182, %cst_84 {dimension_numbers = #tpu.dot_dimension_numbers<[1], [0], [0], [1], [0, 0, 1, 1], [], []>} : vector<4x4xf32>, vector<4x16xf32>, vector<4x16xf32> -> vector<4x16xf32>
    %c2 = arith.constant 2 : index
    %c0_85 = arith.constant 0 : index
    %c0_86 = arith.constant 0 : index
    %190 = vector.load %arg6[%c2, %c0_85, %c0_86] : memref<7x4x4xf32, #tpu.memory_space<vmem>>, vector<1x4x4xf32>
    %191 = vector.shape_cast %190 : vector<1x4x4xf32> to vector<4x4xf32>
    %cst_87 = arith.constant dense<0.000000e+00> : vector<4x16xf32>
    %192 = tpu.matmul %191, %182, %cst_87 {dimension_numbers = #tpu.dot_dimension_numbers<[1], [0], [0], [1], [0, 0, 1, 1], [], []>} : vector<4x4xf32>, vector<4x16xf32>, vector<4x16xf32> -> vector<4x16xf32>
    %c3 = arith.constant 3 : index
    %c0_88 = arith.constant 0 : index
    %c0_89 = arith.constant 0 : index
    %193 = vector.load %arg6[%c3, %c0_88, %c0_89] : memref<7x4x4xf32, #tpu.memory_space<vmem>>, vector<1x4x4xf32>
    %194 = vector.shape_cast %193 : vector<1x4x4xf32> to vector<4x4xf32>
    %cst_90 = arith.constant dense<0.000000e+00> : vector<4x16xf32>
    %195 = tpu.matmul %194, %182, %cst_90 {dimension_numbers = #tpu.dot_dimension_numbers<[1], [0], [0], [1], [0, 0, 1, 1], [], []>} : vector<4x4xf32>, vector<4x16xf32>, vector<4x16xf32> -> vector<4x16xf32>
    %c4 = arith.constant 4 : index
    %c0_91 = arith.constant 0 : index
    %c0_92 = arith.constant 0 : index
    %196 = vector.load %arg6[%c4, %c0_91, %c0_92] : memref<7x4x4xf32, #tpu.memory_space<vmem>>, vector<1x4x4xf32>
    %197 = vector.shape_cast %196 : vector<1x4x4xf32> to vector<4x4xf32>
    %cst_93 = arith.constant dense<0.000000e+00> : vector<4x16xf32>
    %198 = tpu.matmul %197, %182, %cst_93 {dimension_numbers = #tpu.dot_dimension_numbers<[1], [0], [0], [1], [0, 0, 1, 1], [], []>} : vector<4x4xf32>, vector<4x16xf32>, vector<4x16xf32> -> vector<4x16xf32>
    %c5 = arith.constant 5 : index
    %c0_94 = arith.constant 0 : index
    %c0_95 = arith.constant 0 : index
    %199 = vector.load %arg6[%c5, %c0_94, %c0_95] : memref<7x4x4xf32, #tpu.memory_space<vmem>>, vector<1x4x4xf32>
    %200 = vector.shape_cast %199 : vector<1x4x4xf32> to vector<4x4xf32>
    %cst_96 = arith.constant dense<0.000000e+00> : vector<4x16xf32>
    %201 = tpu.matmul %200, %182, %cst_96 {dimension_numbers = #tpu.dot_dimension_numbers<[1], [0], [0], [1], [0, 0, 1, 1], [], []>} : vector<4x4xf32>, vector<4x16xf32>, vector<4x16xf32> -> vector<4x16xf32>
    %c6 = arith.constant 6 : index
    %c0_97 = arith.constant 0 : index
    %c0_98 = arith.constant 0 : index
    %202 = vector.load %arg6[%c6, %c0_97, %c0_98] : memref<7x4x4xf32, #tpu.memory_space<vmem>>, vector<1x4x4xf32>
    %203 = vector.shape_cast %202 : vector<1x4x4xf32> to vector<4x4xf32>
    %cst_99 = arith.constant dense<0.000000e+00> : vector<4x16xf32>
    %204 = tpu.matmul %203, %182, %cst_99 {dimension_numbers = #tpu.dot_dimension_numbers<[1], [0], [0], [1], [0, 0, 1, 1], [], []>} : vector<4x4xf32>, vector<4x16xf32>, vector<4x16xf32> -> vector<4x16xf32>
    %c0_100 = arith.constant 0 : index
    %c0_101 = arith.constant 0 : index
    %c0_102 = arith.constant 0 : index
    %205 = vector.load %arg6[%c0_100, %c0_101, %c0_102] : memref<7x4x4xf32, #tpu.memory_space<vmem>>, vector<1x4x4xf32>
    %206 = vector.shape_cast %205 : vector<1x4x4xf32> to vector<4x4xf32>
    %cst_103 = arith.constant dense<0.000000e+00> : vector<4x16xf32>
    %207 = tpu.matmul %206, %183, %cst_103 {dimension_numbers = #tpu.dot_dimension_numbers<[1], [0], [0], [1], [0, 0, 1, 1], [], []>} : vector<4x4xf32>, vector<4x16xf32>, vector<4x16xf32> -> vector<4x16xf32>
    %c1_104 = arith.constant 1 : index
    %c0_105 = arith.constant 0 : index
    %c0_106 = arith.constant 0 : index
    %208 = vector.load %arg6[%c1_104, %c0_105, %c0_106] : memref<7x4x4xf32, #tpu.memory_space<vmem>>, vector<1x4x4xf32>
    %209 = vector.shape_cast %208 : vector<1x4x4xf32> to vector<4x4xf32>
    %cst_107 = arith.constant dense<0.000000e+00> : vector<4x16xf32>
    %210 = tpu.matmul %209, %183, %cst_107 {dimension_numbers = #tpu.dot_dimension_numbers<[1], [0], [0], [1], [0, 0, 1, 1], [], []>} : vector<4x4xf32>, vector<4x16xf32>, vector<4x16xf32> -> vector<4x16xf32>
    %c2_108 = arith.constant 2 : index
    %c0_109 = arith.constant 0 : index
    %c0_110 = arith.constant 0 : index
    %211 = vector.load %arg6[%c2_108, %c0_109, %c0_110] : memref<7x4x4xf32, #tpu.memory_space<vmem>>, vector<1x4x4xf32>
    %212 = vector.shape_cast %211 : vector<1x4x4xf32> to vector<4x4xf32>
    %cst_111 = arith.constant dense<0.000000e+00> : vector<4x16xf32>
    %213 = tpu.matmul %212, %183, %cst_111 {dimension_numbers = #tpu.dot_dimension_numbers<[1], [0], [0], [1], [0, 0, 1, 1], [], []>} : vector<4x4xf32>, vector<4x16xf32>, vector<4x16xf32> -> vector<4x16xf32>
    %c3_112 = arith.constant 3 : index
    %c0_113 = arith.constant 0 : index
    %c0_114 = arith.constant 0 : index
    %214 = vector.load %arg6[%c3_112, %c0_113, %c0_114] : memref<7x4x4xf32, #tpu.memory_space<vmem>>, vector<1x4x4xf32>
    %215 = vector.shape_cast %214 : vector<1x4x4xf32> to vector<4x4xf32>
    %cst_115 = arith.constant dense<0.000000e+00> : vector<4x16xf32>
    %216 = tpu.matmul %215, %183, %cst_115 {dimension_numbers = #tpu.dot_dimension_numbers<[1], [0], [0], [1], [0, 0, 1, 1], [], []>} : vector<4x4xf32>, vector<4x16xf32>, vector<4x16xf32> -> vector<4x16xf32>
    %c4_116 = arith.constant 4 : index
    %c0_117 = arith.constant 0 : index
    %c0_118 = arith.constant 0 : index
    %217 = vector.load %arg6[%c4_116, %c0_117, %c0_118] : memref<7x4x4xf32, #tpu.memory_space<vmem>>, vector<1x4x4xf32>
    %218 = vector.shape_cast %217 : vector<1x4x4xf32> to vector<4x4xf32>
    %cst_119 = arith.constant dense<0.000000e+00> : vector<4x16xf32>
    %219 = tpu.matmul %218, %183, %cst_119 {dimension_numbers = #tpu.dot_dimension_numbers<[1], [0], [0], [1], [0, 0, 1, 1], [], []>} : vector<4x4xf32>, vector<4x16xf32>, vector<4x16xf32> -> vector<4x16xf32>
    %c5_120 = arith.constant 5 : index
    %c0_121 = arith.constant 0 : index
    %c0_122 = arith.constant 0 : index
    %220 = vector.load %arg6[%c5_120, %c0_121, %c0_122] : memref<7x4x4xf32, #tpu.memory_space<vmem>>, vector<1x4x4xf32>
    %221 = vector.shape_cast %220 : vector<1x4x4xf32> to vector<4x4xf32>
    %cst_123 = arith.constant dense<0.000000e+00> : vector<4x16xf32>
    %222 = tpu.matmul %221, %183, %cst_123 {dimension_numbers = #tpu.dot_dimension_numbers<[1], [0], [0], [1], [0, 0, 1, 1], [], []>} : vector<4x4xf32>, vector<4x16xf32>, vector<4x16xf32> -> vector<4x16xf32>
    %c6_124 = arith.constant 6 : index
    %c0_125 = arith.constant 0 : index
    %c0_126 = arith.constant 0 : index
    %223 = vector.load %arg6[%c6_124, %c0_125, %c0_126] : memref<7x4x4xf32, #tpu.memory_space<vmem>>, vector<1x4x4xf32>
    %224 = vector.shape_cast %223 : vector<1x4x4xf32> to vector<4x4xf32>
    %cst_127 = arith.constant dense<0.000000e+00> : vector<4x16xf32>
    %225 = tpu.matmul %224, %183, %cst_127 {dimension_numbers = #tpu.dot_dimension_numbers<[1], [0], [0], [1], [0, 0, 1, 1], [], []>} : vector<4x4xf32>, vector<4x16xf32>, vector<4x16xf32> -> vector<4x16xf32>
    %226 = tpu.concatenate %186, %189, %192, %195, %198, %201, %204, %207, %210, %213, %216, %219, %222, %225 in 1 : vector<4x16xf32>, vector<4x16xf32>, vector<4x16xf32>, vector<4x16xf32>, vector<4x16xf32>, vector<4x16xf32>, vector<4x16xf32>, vector<4x16xf32>, vector<4x16xf32>, vector<4x16xf32>, vector<4x16xf32>, vector<4x16xf32>, vector<4x16xf32>, vector<4x16xf32> -> vector<4x224xf32>
    %c0_128 = arith.constant 0 : index
    %c0_129 = arith.constant 0 : index
    %227 = vector.load %arg4[%c0_128, %c0_129] : memref<224x16xf32, #tpu.memory_space<vmem>>, vector<224x16xf32>
    %cst_130 = arith.constant dense<0.000000e+00> : vector<4x16xf32>
    %228 = tpu.matmul %226, %227, %cst_130 {dimension_numbers = #tpu.dot_dimension_numbers<[1], [0], [0], [1], [0, 0, 1, 1], [], []>} : vector<4x224xf32>, vector<224x16xf32>, vector<4x16xf32> -> vector<4x16xf32>
    %229 = vector.broadcast %181 : f32 to vector<4x16xf32>
    %230 = arith.addf %228, %229 : vector<4x16xf32>
    %231 = arith.negf %230 : vector<4x16xf32>
    %232 = math.exp %231 : vector<4x16xf32>
    %cst_131 = arith.constant 1.000000e+00 : f32
    %233 = vector.broadcast %cst_131 : f32 to vector<4x16xf32>
    %234 = arith.addf %233, %232 : vector<4x16xf32>
    %235 = arith.divf %233, %234 : vector<4x16xf32>
    %236 = vector.shape_cast %235 : vector<4x16xf32> to vector<1x4x16xf32>
    %c2_132 = arith.constant 2 : index
    %237 = memref.load %arg1[%c2_132] : memref<3xf32, #tpu.memory_space<smem>>
    %238 = vector.shape_cast %9 : vector<1x4x16xf32> to vector<4x16xf32>
    %239 = vector.shape_cast %12 : vector<1x4x16xf32> to vector<4x16xf32>
    %c0_133 = arith.constant 0 : index
    %c0_134 = arith.constant 0 : index
    %c0_135 = arith.constant 0 : index
    %240 = vector.load %arg6[%c0_133, %c0_134, %c0_135] : memref<7x4x4xf32, #tpu.memory_space<vmem>>, vector<1x4x4xf32>
    %241 = vector.shape_cast %240 : vector<1x4x4xf32> to vector<4x4xf32>
    %cst_136 = arith.constant dense<0.000000e+00> : vector<4x16xf32>
    %242 = tpu.matmul %241, %238, %cst_136 {dimension_numbers = #tpu.dot_dimension_numbers<[1], [0], [0], [1], [0, 0, 1, 1], [], []>} : vector<4x4xf32>, vector<4x16xf32>, vector<4x16xf32> -> vector<4x16xf32>
    %c1_137 = arith.constant 1 : index
    %c0_138 = arith.constant 0 : index
    %c0_139 = arith.constant 0 : index
    %243 = vector.load %arg6[%c1_137, %c0_138, %c0_139] : memref<7x4x4xf32, #tpu.memory_space<vmem>>, vector<1x4x4xf32>
    %244 = vector.shape_cast %243 : vector<1x4x4xf32> to vector<4x4xf32>
    %cst_140 = arith.constant dense<0.000000e+00> : vector<4x16xf32>
    %245 = tpu.matmul %244, %238, %cst_140 {dimension_numbers = #tpu.dot_dimension_numbers<[1], [0], [0], [1], [0, 0, 1, 1], [], []>} : vector<4x4xf32>, vector<4x16xf32>, vector<4x16xf32> -> vector<4x16xf32>
    %c2_141 = arith.constant 2 : index
    %c0_142 = arith.constant 0 : index
    %c0_143 = arith.constant 0 : index
    %246 = vector.load %arg6[%c2_141, %c0_142, %c0_143] : memref<7x4x4xf32, #tpu.memory_space<vmem>>, vector<1x4x4xf32>
    %247 = vector.shape_cast %246 : vector<1x4x4xf32> to vector<4x4xf32>
    %cst_144 = arith.constant dense<0.000000e+00> : vector<4x16xf32>
    %248 = tpu.matmul %247, %238, %cst_144 {dimension_numbers = #tpu.dot_dimension_numbers<[1], [0], [0], [1], [0, 0, 1, 1], [], []>} : vector<4x4xf32>, vector<4x16xf32>, vector<4x16xf32> -> vector<4x16xf32>
    %c3_145 = arith.constant 3 : index
    %c0_146 = arith.constant 0 : index
    %c0_147 = arith.constant 0 : index
    %249 = vector.load %arg6[%c3_145, %c0_146, %c0_147] : memref<7x4x4xf32, #tpu.memory_space<vmem>>, vector<1x4x4xf32>
    %250 = vector.shape_cast %249 : vector<1x4x4xf32> to vector<4x4xf32>
    %cst_148 = arith.constant dense<0.000000e+00> : vector<4x16xf32>
    %251 = tpu.matmul %250, %238, %cst_148 {dimension_numbers = #tpu.dot_dimension_numbers<[1], [0], [0], [1], [0, 0, 1, 1], [], []>} : vector<4x4xf32>, vector<4x16xf32>, vector<4x16xf32> -> vector<4x16xf32>
    %c4_149 = arith.constant 4 : index
    %c0_150 = arith.constant 0 : index
    %c0_151 = arith.constant 0 : index
    %252 = vector.load %arg6[%c4_149, %c0_150, %c0_151] : memref<7x4x4xf32, #tpu.memory_space<vmem>>, vector<1x4x4xf32>
    %253 = vector.shape_cast %252 : vector<1x4x4xf32> to vector<4x4xf32>
    %cst_152 = arith.constant dense<0.000000e+00> : vector<4x16xf32>
    %254 = tpu.matmul %253, %238, %cst_152 {dimension_numbers = #tpu.dot_dimension_numbers<[1], [0], [0], [1], [0, 0, 1, 1], [], []>} : vector<4x4xf32>, vector<4x16xf32>, vector<4x16xf32> -> vector<4x16xf32>
    %c5_153 = arith.constant 5 : index
    %c0_154 = arith.constant 0 : index
    %c0_155 = arith.constant 0 : index
    %255 = vector.load %arg6[%c5_153, %c0_154, %c0_155] : memref<7x4x4xf32, #tpu.memory_space<vmem>>, vector<1x4x4xf32>
    %256 = vector.shape_cast %255 : vector<1x4x4xf32> to vector<4x4xf32>
    %cst_156 = arith.constant dense<0.000000e+00> : vector<4x16xf32>
    %257 = tpu.matmul %256, %238, %cst_156 {dimension_numbers = #tpu.dot_dimension_numbers<[1], [0], [0], [1], [0, 0, 1, 1], [], []>} : vector<4x4xf32>, vector<4x16xf32>, vector<4x16xf32> -> vector<4x16xf32>
    %c6_157 = arith.constant 6 : index
    %c0_158 = arith.constant 0 : index
    %c0_159 = arith.constant 0 : index
    %258 = vector.load %arg6[%c6_157, %c0_158, %c0_159] : memref<7x4x4xf32, #tpu.memory_space<vmem>>, vector<1x4x4xf32>
    %259 = vector.shape_cast %258 : vector<1x4x4xf32> to vector<4x4xf32>
    %cst_160 = arith.constant dense<0.000000e+00> : vector<4x16xf32>
    %260 = tpu.matmul %259, %238, %cst_160 {dimension_numbers = #tpu.dot_dimension_numbers<[1], [0], [0], [1], [0, 0, 1, 1], [], []>} : vector<4x4xf32>, vector<4x16xf32>, vector<4x16xf32> -> vector<4x16xf32>
    %c0_161 = arith.constant 0 : index
    %c0_162 = arith.constant 0 : index
    %c0_163 = arith.constant 0 : index
    %261 = vector.load %arg6[%c0_161, %c0_162, %c0_163] : memref<7x4x4xf32, #tpu.memory_space<vmem>>, vector<1x4x4xf32>
    %262 = vector.shape_cast %261 : vector<1x4x4xf32> to vector<4x4xf32>
    %cst_164 = arith.constant dense<0.000000e+00> : vector<4x16xf32>
    %263 = tpu.matmul %262, %239, %cst_164 {dimension_numbers = #tpu.dot_dimension_numbers<[1], [0], [0], [1], [0, 0, 1, 1], [], []>} : vector<4x4xf32>, vector<4x16xf32>, vector<4x16xf32> -> vector<4x16xf32>
    %c1_165 = arith.constant 1 : index
    %c0_166 = arith.constant 0 : index
    %c0_167 = arith.constant 0 : index
    %264 = vector.load %arg6[%c1_165, %c0_166, %c0_167] : memref<7x4x4xf32, #tpu.memory_space<vmem>>, vector<1x4x4xf32>
    %265 = vector.shape_cast %264 : vector<1x4x4xf32> to vector<4x4xf32>
    %cst_168 = arith.constant dense<0.000000e+00> : vector<4x16xf32>
    %266 = tpu.matmul %265, %239, %cst_168 {dimension_numbers = #tpu.dot_dimension_numbers<[1], [0], [0], [1], [0, 0, 1, 1], [], []>} : vector<4x4xf32>, vector<4x16xf32>, vector<4x16xf32> -> vector<4x16xf32>
    %c2_169 = arith.constant 2 : index
    %c0_170 = arith.constant 0 : index
    %c0_171 = arith.constant 0 : index
    %267 = vector.load %arg6[%c2_169, %c0_170, %c0_171] : memref<7x4x4xf32, #tpu.memory_space<vmem>>, vector<1x4x4xf32>
    %268 = vector.shape_cast %267 : vector<1x4x4xf32> to vector<4x4xf32>
    %cst_172 = arith.constant dense<0.000000e+00> : vector<4x16xf32>
    %269 = tpu.matmul %268, %239, %cst_172 {dimension_numbers = #tpu.dot_dimension_numbers<[1], [0], [0], [1], [0, 0, 1, 1], [], []>} : vector<4x4xf32>, vector<4x16xf32>, vector<4x16xf32> -> vector<4x16xf32>
    %c3_173 = arith.constant 3 : index
    %c0_174 = arith.constant 0 : index
    %c0_175 = arith.constant 0 : index
    %270 = vector.load %arg6[%c3_173, %c0_174, %c0_175] : memref<7x4x4xf32, #tpu.memory_space<vmem>>, vector<1x4x4xf32>
    %271 = vector.shape_cast %270 : vector<1x4x4xf32> to vector<4x4xf32>
    %cst_176 = arith.constant dense<0.000000e+00> : vector<4x16xf32>
    %272 = tpu.matmul %271, %239, %cst_176 {dimension_numbers = #tpu.dot_dimension_numbers<[1], [0], [0], [1], [0, 0, 1, 1], [], []>} : vector<4x4xf32>, vector<4x16xf32>, vector<4x16xf32> -> vector<4x16xf32>
    %c4_177 = arith.constant 4 : index
    %c0_178 = arith.constant 0 : index
    %c0_179 = arith.constant 0 : index
    %273 = vector.load %arg6[%c4_177, %c0_178, %c0_179] : memref<7x4x4xf32, #tpu.memory_space<vmem>>, vector<1x4x4xf32>
    %274 = vector.shape_cast %273 : vector<1x4x4xf32> to vector<4x4xf32>
    %cst_180 = arith.constant dense<0.000000e+00> : vector<4x16xf32>
    %275 = tpu.matmul %274, %239, %cst_180 {dimension_numbers = #tpu.dot_dimension_numbers<[1], [0], [0], [1], [0, 0, 1, 1], [], []>} : vector<4x4xf32>, vector<4x16xf32>, vector<4x16xf32> -> vector<4x16xf32>
    %c5_181 = arith.constant 5 : index
    %c0_182 = arith.constant 0 : index
    %c0_183 = arith.constant 0 : index
    %276 = vector.load %arg6[%c5_181, %c0_182, %c0_183] : memref<7x4x4xf32, #tpu.memory_space<vmem>>, vector<1x4x4xf32>
    %277 = vector.shape_cast %276 : vector<1x4x4xf32> to vector<4x4xf32>
    %cst_184 = arith.constant dense<0.000000e+00> : vector<4x16xf32>
    %278 = tpu.matmul %277, %239, %cst_184 {dimension_numbers = #tpu.dot_dimension_numbers<[1], [0], [0], [1], [0, 0, 1, 1], [], []>} : vector<4x4xf32>, vector<4x16xf32>, vector<4x16xf32> -> vector<4x16xf32>
    %c6_185 = arith.constant 6 : index
    %c0_186 = arith.constant 0 : index
    %c0_187 = arith.constant 0 : index
    %279 = vector.load %arg6[%c6_185, %c0_186, %c0_187] : memref<7x4x4xf32, #tpu.memory_space<vmem>>, vector<1x4x4xf32>
    %280 = vector.shape_cast %279 : vector<1x4x4xf32> to vector<4x4xf32>
    %cst_188 = arith.constant dense<0.000000e+00> : vector<4x16xf32>
    %281 = tpu.matmul %280, %239, %cst_188 {dimension_numbers = #tpu.dot_dimension_numbers<[1], [0], [0], [1], [0, 0, 1, 1], [], []>} : vector<4x4xf32>, vector<4x16xf32>, vector<4x16xf32> -> vector<4x16xf32>
    %282 = tpu.concatenate %242, %245, %248, %251, %254, %257, %260, %263, %266, %269, %272, %275, %278, %281 in 1 : vector<4x16xf32>, vector<4x16xf32>, vector<4x16xf32>, vector<4x16xf32>, vector<4x16xf32>, vector<4x16xf32>, vector<4x16xf32>, vector<4x16xf32>, vector<4x16xf32>, vector<4x16xf32>, vector<4x16xf32>, vector<4x16xf32>, vector<4x16xf32>, vector<4x16xf32> -> vector<4x224xf32>
    %c0_189 = arith.constant 0 : index
    %c0_190 = arith.constant 0 : index
    %283 = vector.load %arg5[%c0_189, %c0_190] : memref<224x16xf32, #tpu.memory_space<vmem>>, vector<224x16xf32>
    %cst_191 = arith.constant dense<0.000000e+00> : vector<4x16xf32>
    %284 = tpu.matmul %282, %283, %cst_191 {dimension_numbers = #tpu.dot_dimension_numbers<[1], [0], [0], [1], [0, 0, 1, 1], [], []>} : vector<4x224xf32>, vector<224x16xf32>, vector<4x16xf32> -> vector<4x16xf32>
    %285 = vector.broadcast %237 : f32 to vector<4x16xf32>
    %286 = arith.addf %284, %285 : vector<4x16xf32>
    %287 = arith.negf %286 : vector<4x16xf32>
    %288 = math.exp %287 : vector<4x16xf32>
    %cst_192 = arith.constant 1.000000e+00 : f32
    %289 = vector.broadcast %cst_192 : f32 to vector<4x16xf32>
    %290 = arith.addf %289, %288 : vector<4x16xf32>
    %291 = arith.divf %289, %290 : vector<4x16xf32>
    %292 = vector.shape_cast %291 : vector<4x16xf32> to vector<1x4x16xf32>
    %293 = vector.shape_cast %180 : vector<1x16x16xf32> to vector<1x1x16x16xf32>
    %294 = vector.shape_cast %236 : vector<1x4x16xf32> to vector<1x4x1x16xf32>
    %295 = vector.broadcast %293 : vector<1x1x16x16xf32> to vector<1x4x16x16xf32>
    %296 = vector.broadcast %294 : vector<1x4x1x16xf32> to vector<1x4x16x16xf32>
    %297 = arith.addf %295, %296 : vector<1x4x16x16xf32>
    %298 = vector.shape_cast %292 : vector<1x4x16xf32> to vector<1x4x16x1xf32>
    %299 = vector.broadcast %298 : vector<1x4x16x1xf32> to vector<1x4x16x16xf32>
    %300 = arith.addf %297, %299 : vector<1x4x16x16xf32>
    %cst_193 = arith.constant 0.333333343 : f32
    %301 = vector.broadcast %cst_193 : f32 to vector<1x4x16x16xf32>
    %302 = arith.mulf %300, %301 : vector<1x4x16x16xf32>
    %303 = arith.mulf %0, %302 : vector<1x4x16x16xf32>
    %c0_194 = arith.constant 0 : index
    %c0_195 = arith.constant 0 : index
    %c0_196 = arith.constant 0 : index
    %c0_197 = arith.constant 0 : index
    %304 = vector.load %arg7[%c0_194, %c0_195, %c0_196, %c0_197] : memref<1x4x16x16xf32, #tpu.memory_space<vmem>>, vector<1x4x16x16xf32>
    tpu.vector_store %arg7[%c0_194, %c0_195, %c0_196, %c0_197], %303 {strides = array<i32>} : memref<1x4x16x16xf32, #tpu.memory_space<vmem>>, vector<1x4x16x16xf32>,
    return
  }
  func.func @transform_0(%arg0: i32) -> i32 {
    %c0_i32 = arith.constant 0 : i32
    %c0_i32_0 = arith.constant 0 : i32
    return %c0_i32 : i32
  }
  func.func @transform_1(%arg0: i32) -> (i32, i32, i32, i32) {
    %c0_i32 = arith.constant 0 : i32
    %c0_i32_0 = arith.constant 0 : i32
    %c0_i32_1 = arith.constant 0 : i32
    %c0_i32_2 = arith.constant 0 : i32
    return %arg0, %c0_i32, %c0_i32_0, %c0_i32_1 : i32, i32, i32, i32
  }
  func.func @transform_2(%arg0: i32) -> (i32, i32) {
    %c0_i32 = arith.constant 0 : i32
    %c0_i32_0 = arith.constant 0 : i32
    %c0_i32_1 = arith.constant 0 : i32
    return %c0_i32, %c0_i32_0 : i32, i32
  }
  func.func @transform_3(%arg0: i32) -> (i32, i32) {
    %c0_i32 = arith.constant 0 : i32
    %c0_i32_0 = arith.constant 0 : i32
    %c0_i32_1 = arith.constant 0 : i32
    return %c0_i32, %c0_i32_0 : i32, i32
  }
  func.func @transform_4(%arg0: i32) -> (i32, i32) {
    %c0_i32 = arith.constant 0 : i32
    %c0_i32_0 = arith.constant 0 : i32
    %c0_i32_1 = arith.constant 0 : i32
    return %c0_i32, %c0_i32_0 : i32, i32
  }
  func.func @transform_5(%arg0: i32) -> (i32, i32, i32) {
    %c0_i32 = arith.constant 0 : i32
    %c0_i32_0 = arith.constant 0 : i32
    %c0_i32_1 = arith.constant 0 : i32
    %c0_i32_2 = arith.constant 0 : i32
    return %c0_i32, %c0_i32_0, %c0_i32_1 : i32, i32, i32
  }
  func.func @transform_6(%arg0: i32) -> (i32, i32, i32, i32) {
    %c0_i32 = arith.constant 0 : i32
    %c0_i32_0 = arith.constant 0 : i32
    %c0_i32_1 = arith.constant 0 : i32
    %c0_i32_2 = arith.constant 0 : i32
    return %arg0, %c0_i32, %c0_i32_0, %c0_i32_1 : i32, i32, i32, i32
  }
}

</mosaic_0001>

<bundles_post_ra>
// kernel: triplet_attention.1
= control target key start
LH: loop header
LB: loop body
LE: loop exit
PB: predicated region body
PF: predicated region fallthrough
CT: control target
= control target key end

     0   :  { %11 = vsyncpa [#allocation4], 0  ;;  %s5254_s0 = inlined_call_operand.vmem [shape: f32[3], index: 0, kind: input, shape index: {}]   ;;  %s5255_s1 = inlined_call_operand.vmem [shape: f32[2,4,16,16], index: 1, kind: input, shape index: {}]   ;;  %s5256_s2 = inlined_call_operand.vmem [shape: f32[224,16], index: 2, kind: input, shape index: {}]   ;;  %s5257_s3 = inlined_call_operand.vmem [shape: f32[224,16], index: 3, kind: input, shape index: {}]   ;;  %s5258_s4 = inlined_call_operand.vmem [shape: f32[224,16], index: 4, kind: input, shape index: {}]   ;;  %s5259_s5 = inlined_call_operand.vmem [shape: f32[7,4,4], index: 5, kind: input, shape index: {}]   ;;  %s5260_s6 = inlined_call_operand.hbm [shape: f32[2,4,16,16], index: 6, kind: output, shape index: {}]  }
   0x1   :  { %12 = vsyncpa [#allocation3], 0 }
   0x2   :  { %14 = vsyncpa [#allocation3 + $0x1], 0  ;;  %s4021_s21 = smov 0   ;;  %s4023_s22 = smov 0  }
   0x3   :  { %s4025_s23 = smov 0   ;;  %s4027_s24 = smov 0  }
   0x4 LB: > { %s4042_s25 = sadd.s32 4294967295, %s3970_s24   ;;  %s3479_s26 = sadd.s32 4294967294, %s3970_s24   ;;  %s3970_s24 = sphi %s4027_s24, %s5283_s24   ;;  %s3966_s23 = sphi %s4025_s23, %s5282_s23   ;;  %s3962_s22 = sphi %s4023_s22, %s5281_s22   ;;  %s3958_s21 = sphi %s4021_s21, %s5280_s21  }
   0x5   : > { %s4046_s27 = sadd.s32 1, %s3970_s24   ;;  %s158_s28 = sadd.s32 1, %s3966_s23 }
   0x6   : > { %s155_s29 = ssub.s32 %s3970_s24, %s4046_s27  ;;  %p168_p0 = scmp.ne.s32.totalorder %s3966_s23, %s3962_s22 }
   0x7   : > { %p156_p1 = scmp.eq.s32.totalorder %s155_s29, 0  ;;  %p169_p2 = scmp.eq.s32.totalorder %s4042_s25, 1 }
   0x8   : > { %p174_p3 = scmp.ne.s32.totalorder %s3962_s22, %s3958_s21  ;;  %p175_p4 = scmp.eq.s32.totalorder %s3479_s26, 1 }
   0x9   : > { %s4057_s30 = scalar_select %p156_p1, %s3966_s23, %s158_s28  }
   0xa   : > { %p4059_p5 = por %p169_p2, %p168_p0  ;;  %p4063_p6 = por %p175_p4, %p174_p3 }
   0xb   : > { %p3480_p7 = scmp.ge.s32.totalorder %s3970_s24, 1  ;;  %p182_p8 = scmp.lt.s32.totalorder %s3970_s24, 3 }
   0xc   : > { %p3777_p9 = scmp.eq.s32.totalorder %s4042_s25, 0  ;;  %s195_s12 = sshll.u32 %s5254_s0, 4  ;;  %s196_s12 = int_to_ptr.vmem [resolvable:$true] %s195_s12 }
   0xd   : > { %p4070_p10 = pnand %p3480_p7, %p182_p8  ;;  %s3891_s13 = scalar_lea.vmem %s196_s12, 16 }
   0xe   : > { %p3892_p13 = scmp.ne.s32.totalorder %s196_s12, %s3891_s13  ;;  %p3899_p3 = scmp.lt.s32.totalorder %s196_s12, %s196_s12 }
   0xf   : > { %p3769_p11 = pneg %p4070_p10  ;;  %p3900_p4 = scmp.lt.s32.totalorder %s3891_s13, %s3891_s13 }
  0x11   : > { %p3770_p12 = pnand %p3777_p9, %p3769_p11  ;;  %p3901_p7 = por %p3900_p4, %p3899_p3 }
  0x13   : > { %p3893_p0 = pneg %p3770_p12 }
  0x15   : > { %p3894_p1 = pnand %p3893_p0, %p3892_p13 }
  0x17   : > { %p3895_p2 = pneg %p3894_p1 }
  0x19   : > { %p3902_p8 = pnand %p3901_p7, %p3895_p2 }
  0x1b   : > { %3905 = shalt.err (!%p3902_p8)
}
  0x1c   : > { %s3972_s14 = smov [#allocation2]   ;;  %228 = sbr.rel (%p4070_p10) target bundleno = 1150 (0x47e), region = 44 }
  0x1d   : > { %3772 = dma.vmem_to_smem (!%p3770_p12), %s196_s12, 16, %s3972_s14, [#allocation4]  }
  0x21   : > { %3949 = dma.done.wait (%p3777_p9), [#allocation4], 16  }
  0x22   : > { %3951 = vsyncadd (%p3777_p9), [#allocation4], 4294967280 }
  0x23   : > { %234 = sfence }
  0x24   : > { %p259_p11 = scmp.lt.s32.totalorder %s4042_s25, 1  ;;  %v3973_v0 = vmov 0.0   ;;  %vm3974_vm0 = vmmov 0   ;;  %vm272_vm1 = vcmask 130048   ;;  %vm811_vm2 = vcmask 1041409   ;;  %s3975_s20 = smov 16  }
  0x25   : > { %3623 = vmatprep.subr.mxu1 %v3973_v0  ;;  %718 = vmatprep.subr.mxu0 %v3973_v0  ;;  %vm813_vm3 = vcmask 1042434   ;;  %vm815_vm4 = vcmask 1043459   ;;  %vm821_vm5 = vcmask 1043456   ;;  %vm5261_vm6 = vcmask 31744   ;;  %s3976_s26 = smov 48   ;;  %s3977_s28 = smov 32  }
  0x26   : > { %s260_s15 = scalar_select %p259_p11, %s4042_s25, 1  ;;  %3625 = vmatprep.mubr.msk.f32.mxu1 %vm3974_vm0, %v3973_v0 }
  0x27   : > { %s3978_s29 = smov 64   ;;  %s3979_s9 = smov 80  }
  0x28   : > { %s3565_s16 = sshll.u32 %s260_s15, 6  ;;  %s3980_s18 = smov 96  }
  0x29   : > { %s4096_s19 = scalar_lea.vmem %s5255_s1, %s3565_s16  ;;  %s5262_s14 = smov 112  }
  0x2a   : > { %v264_v1 = vld [vmem:[%s4096_s19] sm:$0xff]  ;;  %v265_v2 = vld [vmem:[%s4096_s19 + $0x8] sm:$0xff]  ;;  %v266_v3 = vld [vmem:[%s4096_s19 + $0x10] sm:$0xff]  ;;  %s403_s12 = sld [smem:[#allocation2]]  ;;  %s5279_s11 = smov 112  }
  0x2b   : > { %v267_v4 = vld [vmem:[%s4096_s19 + $0x18] sm:$0xff]  ;;  %v268_v5 = vld [vmem:[%s4096_s19 + $0x20] sm:$0xff]  ;;  %v269_v6 = vld [vmem:[%s4096_s19 + $0x28] sm:$0xff]  ;;  %v4105_v7 = vsel %vm272_vm1, %v264_v1, -inf  ;;  %v4108_v8 = vsel %vm272_vm1, %v266_v3, -inf  ;;  %v4111_v9 = vsel %vm272_vm1, %v265_v2, -inf }
  0x2c   : > { %v270_v10 = vld [vmem:[%s4096_s19 + $0x30] sm:$0xff]  ;;  %v271_v11 = vld [vmem:[%s4096_s19 + $0x38] sm:$0xff]  ;;  %v4116_v12 = vsel %vm272_vm1, %v268_v5, -inf  ;;  %v4119_v13 = vsel %vm272_vm1, %v267_v4, -inf  ;;  %v4122_v14 = vsel %vm272_vm1, %v269_v6, -inf  ;;  %v303_v15 = vmax.f32 %v4105_v7, %v4111_v9  ;;  %367 = vmax.xlane.f32.xlu1 %v4108_v8  ;;  %363 = vmax.xlane.f32.xlu0 %v4105_v7  ;;  %s3492_s13 = sld [smem:[#allocation2 + $0x1]] }
  0x2d   : > { %v4129_v16 = vsel %vm272_vm1, %v270_v10, -inf  ;;  %v4132_v17 = vsel %vm272_vm1, %v271_v11, -inf  ;;  %v310_v19 = vmax.f32 %v4108_v8, %v4119_v13  ;;  %v317_v20 = vmax.f32 %v4116_v12, %v4122_v14  ;;  %s3983_s17 = smov [#allocation5]  }
  0x2e   : > { %v304_v18 = vrot.slane %v303_v15, 4  ;;  %v324_v21 = vmax.f32 %v4129_v16, %v4132_v17  ;;  %v287_v30 = vsel %vm272_vm1, %v264_v1, 0.0  ;;  %v294_v31 = vsel %vm272_vm1, %v265_v2, 0.0 }
  0x2f   : > { %v311_v23 = vrot.slane %v310_v19, 4  ;;  %v318_v24 = vrot.slane %v317_v20, 4  ;;  %v288_v34 = vsel %vm272_vm1, %v266_v3, 0.0  ;;  %v295_v35 = vsel %vm272_vm1, %v267_v4, 0.0  ;;  %v4171_v3 = vld [vmem:[%s5259_s5] sm:$0xf] }
  0x30   : > { %v305_v22 = vmax.f32 %v303_v15, %v304_v18  ;;  %369 = vmax.xlane.f32.xlu1 %v4119_v13  ;;  %365 = vmax.xlane.f32.xlu0 %v4111_v9  ;;  %v325_v25 = vrot.slane %v324_v21, 4  ;;  %v4149_v38 = vsel %vm272_vm1, %v268_v5, 0.0  ;;  %v4152_v39 = vsel %vm272_vm1, %v270_v10, 0.0 }
  0x31   : > { %v312_v27 = vmax.f32 %v310_v19, %v311_v23  ;;  %v319_v28 = vmax.f32 %v317_v20, %v318_v24  ;;  %v4155_v42 = vsel %vm272_vm1, %v269_v6, 0.0  ;;  %v331_v43 = vadd.f32 %v294_v31, %v287_v30  ;;  %v4188_v19 = vld [vmem:[%s5259_s5 + $0x4] sm:$0xf] }
  0x32   : > { %v306_v26 = vrot.slane %v305_v22, 2  ;;  %v326_v29 = vmax.f32 %v324_v21, %v325_v25  ;;  %v4158_v46 = vsel %vm272_vm1, %v271_v11, 0.0  ;;  %v338_v47 = vadd.f32 %v295_v35, %v288_v34 }
  0x33   : > { %v313_v33 = vrot.slane %v312_v27, 2  ;;  %v320_v36 = vrot.slane %v319_v28, 2  ;;  %v332_v50 = vrot.slane %v331_v43, 4  ;;  %v345_v54 = vadd.f32 %v4155_v42, %v4149_v38 }
  0x34   : > { %v307_v32 = vmax.f32 %v305_v22, %v306_v26  ;;  %373 = vmax.xlane.f32.xlu1 %v4122_v14  ;;  %371 = vmax.xlane.f32.xlu0 %v4116_v12  ;;  %v327_v37 = vrot.slane %v326_v29, 2  ;;  %v339_v53 = vrot.slane %v338_v47, 4  ;;  %v352_v57 = vadd.f32 %v4158_v46, %v4152_v39  ;;  %v4200_v26 = vld [vmem:[%s5259_s5 + $0x8] sm:$0xf] }
  0x35   : > { %v314_v41 = vmax.f32 %v312_v27, %v313_v33  ;;  %v321_v44 = vmax.f32 %v319_v28, %v320_v36  ;;  %v333_v56 = vadd.f32 %v332_v50, %v331_v43  ;;  %v346_v61 = vrot.slane %v345_v54, 4  ;;  %v4235_v43 = vld [vmem:[%s5259_s5 + $0x10] sm:$0xf] }
  0x36   : > { %v308_v40 = vrot.slane %v307_v32, 1  ;;  %v328_v45 = vmax.f32 %v326_v29, %v327_v37  ;;  %v340_v60 = vadd.f32 %v339_v53, %v338_v47  ;;  %v353_v1 = vrot.slane %v352_v57, 4 }
  0x37   : > { %v315_v49 = vrot.slane %v314_v41, 1  ;;  %v322_v51 = vrot.slane %v321_v44, 1  ;;  %v334_v63 = vrot.slane %v333_v56, 2  ;;  %v347_v5 = vadd.f32 %v346_v61, %v345_v54 }
  0x38   : > { %v309_v48 = vmax.f32 %v307_v32, %v308_v40  ;;  %377 = vmax.xlane.f32.xlu1 %v4132_v17  ;;  %375 = vmax.xlane.f32.xlu0 %v4129_v16  ;;  %v329_v52 = vrot.slane %v328_v45, 1  ;;  %v341_v4 = vrot.slane %v340_v60, 2  ;;  %v354_v10 = vadd.f32 %v353_v1, %v352_v57 }
  0x39   : > { %v316_v55 = vmax.f32 %v314_v41, %v315_v49  ;;  %v323_v58 = vmax.f32 %v321_v44, %v322_v51  ;;  %v348_v11 = vrot.slane %v347_v5, 2  ;;  %v335_v15 = vadd.f32 %v334_v63, %v333_v56  ;;  %v4255_v49 = vld [vmem:[%s5259_s5 + $0x14] sm:$0xf] }
  0x3a   : > { %v330_v59 = vmax.f32 %v328_v45, %v329_v52  ;;  %v342_v18 = vadd.f32 %v341_v4, %v340_v60  ;;  %v289_v20 = vadd.f32 %v288_v34, %v287_v30  ;;  %v296_v21 = vadd.f32 %v295_v35, %v294_v31 }
  0x3b   : > { %v812_v62 = vsel %vm811_vm2, %v316_v55, %v309_v48  ;;  %v355_v22 = vrot.slane %v354_v10, 2  ;;  %v349_v23 = vadd.f32 %v348_v11, %v347_v5  ;;  %v336_v24 = vrot.slane %v335_v15, 1 }
  0x3c   : > { %381 = vadd.xlane.f32.xlu1 %v294_v31  ;;  %379 = vadd.xlane.f32.xlu0 %v287_v30  ;;  %v814_v2 = vsel %vm813_vm3, %v323_v58, %v812_v62  ;;  %v343_v25 = vrot.slane %v342_v18, 1  ;;  %v291_v27 = vadd.f32 %v4149_v38, %v289_v20  ;;  %v298_v28 = vadd.f32 %v4155_v42, %v296_v21 }
  0x3d   : > { %v4174_v6 = vsel %vm815_vm4, %v330_v59, %v814_v2  ;;  %v404_v29 = vlaneseq  ;;  %v356_v30 = vadd.f32 %v355_v22, %v354_v10  ;;  %v350_v31 = vrot.slane %v349_v23, 1 }
  0x3e   : > { %3624 = vmatpush3.msk.msra.mxu1 %vm821_vm5, %v4174_v6  ;;  %v337_v32 = vadd.f32 %v336_v24, %v335_v15  ;;  %v344_v33 = vadd.f32 %v343_v25, %v342_v18  ;;  %v300_v36 = vadd.f32 %v4158_v46, %v298_v28  ;;  %v276_v54 = vmax.f32 %v4105_v7, %v4116_v12  ;;  %v4282_v7 = vld [vmem:[%s5259_s5 + $0x18] sm:$0xf] }
  0x3f   : > { %3626 = vmatmul.mubr.msk.f32.vlgmr.msra.gmra.mxu1 %vm5261_vm6, %v4171_v3  ;;  %3628 = vmatprep.subr.mxu1 %v3973_v0  ;;  %v4221_v37 = vshrl.u32 %v404_v29, 7  ;;  %v351_v40 = vadd.f32 %v350_v31, %v349_v23  ;;  %v278_v55 = vmax.f32 %v4108_v8, %v4129_v16  ;;  %v283_v57 = vmax.f32 %v4111_v9, %v4122_v14 }
  0x40   : > { %3629 = vmatpush3.msk.msra.mxu1 %vm821_vm5, %v4174_v6  ;;  %3630 = vmatprep.mubr.msk.f32.mxu1 %vm3974_vm0, %v3973_v0  ;;  %v359_v41 = vmul.f32 0.0625, %v337_v32  ;;  %v4239_v45 = vmul.f32 0.25, %v300_v36  ;;  %v285_v58 = vmax.f32 %v4119_v13, %v4132_v17 }
  0x41   : > { %3633 = vmatprep.subr.mxu1 %v3973_v0  ;;  %385 = vadd.xlane.f32.xlu1 %v295_v35  ;;  %v293_v35 = vadd.f32 %v4152_v39, %v291_v27  ;;  %v361_v47 = vmul.f32 0.0625, %v351_v40  ;;  %vm463_vm7 = vcmp.lt.s32.totalorder %v4221_v37, 1  ;;  %v4295_v12 = vmax.f32 %v276_v54, %v278_v55  ;;  %v696_v55 = vld [vmem:[%s5256_s2 + $0x68] sm:$0xff] }
  0x42   : > { %383 = vadd.xlane.f32.xlu0 %v288_v34  ;;  %v4216_v34 = vld [vmem:[%s5259_s5 + $0xc] sm:$0xf]  ;;  %v534_v52 = vrot.slane %v4239_v45, 7  ;;  %v4297_v13 = vmax.f32 %v283_v57, %v285_v58  ;;  %v540_v17 = vrot.slane %v4239_v45, 1  ;;  %vm478_vm9 = vcmp.lt.s32.totalorder %v4221_v37, 7 }
  0x43   : > { %3631 = vmatmul.mubr.msk.f32.vlgmr.msra.gmra.mxu1 %vm5261_vm6, %v4188_v19  ;;  %v4237_v44 = vmul.f32 0.25, %v293_v35  ;;  %v446_v60 = vrot.slane %v4295_v12, 6  ;;  %vm448_vm10 = vcmp.lt.s32.totalorder %v4221_v37, 2  ;;  %vm493_vm11 = vcmp.lt.s32.totalorder %v4221_v37, 6 }
  0x44   : > { %3634 = vmatpush3.msk.msra.mxu1 %vm821_vm5, %v4174_v6  ;;  %3635 = vmatprep.mubr.msk.f32.mxu1 %vm3974_vm0, %v3973_v0  ;;  %v447_v61 = vrot.slane %v4297_v13, 6  ;;  %v546_v63 = vrot.slane %v4239_v45, 2  ;;  %v461_v2 = vrot.slane %v4295_v12, 7  ;;  %v406_v4 = vadd.s32 8, %v4221_v37 }
  0x45   : > { %3638 = vmatprep.subr.mxu1 %v3973_v0  ;;  %389 = vadd.xlane.f32.xlu1 %v4155_v42  ;;  %v360_v42 = vmul.f32 0.0625, %v344_v33  ;;  %v533_v51 = vrot.slane %v4237_v44, 7  ;;  %v539_v16 = vrot.slane %v4237_v44, 1  ;;  %v545_v62 = vrot.slane %v4237_v44, 2 }
  0x46   : > { %387 = vadd.xlane.f32.xlu0 %v4149_v38  ;;  %v357_v38 = vrot.slane %v356_v30, 1  ;;  %v449_v1 = vsel %vm448_vm10, %v446_v60, %v447_v61  ;;  %v4361_v10 = vand.u32 15, %v406_v4  ;;  %v551_v11 = vrot.slane %v4237_v44, 3 }
  0x47   : > { %3636 = vmatmul.mubr.msk.f32.vlgmr.msra.gmra.mxu1 %vm5261_vm6, %v4200_v26  ;;  %v1348_v48 = vsel %vm811_vm2, %v360_v42, %v359_v41  ;;  %v536_v8 = vsel %vm463_vm7, %v534_v52, %v533_v51  ;;  %v541_v59 = vsel %vm478_vm9, %v539_v16, %v540_v17  ;;  %v547_v5 = vsel %vm493_vm11, %v545_v62, %v546_v63 }
  0x48   : > { %3639 = vmatpush3.msk.msra.mxu1 %vm821_vm5, %v4174_v6  ;;  %3640 = vmatprep.mubr.msk.f32.mxu1 %vm3974_vm0, %v3973_v0  ;;  %v1349_v56 = vsel %vm813_vm3, %v361_v47, %v1348_v48  ;;  %v552_v15 = vrot.slane %v4239_v45, 3  ;;  %vm508_vm12 = vcmp.lt.s32.totalorder %v4221_v37, 5  ;;  %v535_v18 = vsel %vm463_vm7, %v533_v51, %v534_v52  ;;  %v698_v51 = vld [vmem:[%s5256_s2 + $0x78] sm:$0xff]  ;;  %v697_v52 = vld [vmem:[%s5256_s2 + $0x70] sm:$0xff] }
  0x49   : > { %3643 = vmatprep.subr.mxu1 %v3973_v0  ;;  %393 = vadd.xlane.f32.xlu1 %v4158_v46  ;;  %v358_v46 = vadd.f32 %v357_v38, %v356_v30  ;;  %v477_v20 = vrot.slane %v4297_v13, 1  ;;  %v482_v21 = vadd.s32 1, %v4361_v10  ;;  %v491_v25 = vrot.slane %v4295_v12, 2 }
  0x4a   : > { %391 = vadd.xlane.f32.xlu0 %v4152_v39  ;;  %v4242_v39 = vand.u32 15, %v4221_v37  ;;  %v553_v22 = vsel %vm508_vm12, %v551_v11, %v552_v15  ;;  %v4428_v27 = vadd.s32 2, %v4361_v10  ;;  %v4441_v31 = vsel %vm448_vm10, %v447_v61, %v446_v60  ;;  %719 = vmatpush1.msra.mxu0 %v698_v51  ;;  %v694_v61 = vld [vmem:[%s5256_s2 + $0x58] sm:$0xff] }
  0x4b   : > { %3641 = vmatmul.mubr.msk.f32.vlgmr.msra.gmra.mxu1 %vm5261_vm6, %v4216_v34  ;;  %v362_v53 = vmul.f32 0.0625, %v358_v46  ;;  %vm486_vm13 = vcmp.lt.s32.totalorder %v482_v21, 16  ;;  %v542_v32 = vsel %vm478_vm9, %v540_v17, %v539_v16  ;;  %v432_v36 = vrot.slane %v4297_v13, 5  ;;  %720 = vmatprep.subr.mxu0 %v3973_v0  ;;  %v1917_v16 = vld [vmem:[%s5257_s3 + $0x70] sm:$0xff]  ;;  %v1916_v17 = vld [vmem:[%s5257_s3 + $0x68] sm:$0xff] }
  0x4c   : > { %3644 = vmatpush3.msk.msra.mxu1 %vm821_vm5, %v4174_v6  ;;  %3645 = vmatprep.mubr.msk.f32.mxu1 %vm3974_vm0, %v3973_v0  ;;  %v4258_v50 = vadd.s32 4294967295, %v4242_v39  ;;  %vm501_vm14 = vcmp.lt.s32.totalorder %v4428_v27, 16  ;;  %v544_v33 = vsel %vm486_vm13, %v542_v32, 0.0  ;;  %v4462_v38 = vadd.s32 4294967293, %v4242_v39 }
  0x4d   : > { %3648 = vmatprep.subr.mxu1 %v3973_v0  ;;  %v4293_v9 = vsel %vm815_vm4, %v362_v53, %v1349_v56  ;;  %v431_v40 = vrot.slane %v4295_v12, 5  ;;  %vm433_vm15 = vcmp.lt.s32.totalorder %v4221_v37, 3  ;;  %v528_v46 = vrot.slane %v4239_v45, 6  ;;  %721 = vmatpush1.msra.mxu0 %v697_v52  ;;  %v1918_v56 = vld [vmem:[%s5257_s3 + $0x78] sm:$0xff]  ;;  %v689_v52 = vld [vmem:[%s5256_s2 + $0x30] sm:$0xff] }
  0x4e   : > { %vm468_vm8 = vcmp.ge.s32.totalorder %v4258_v50, 0  ;;  %v2021_v47 = vand.u32 127, %v404_v29  ;;  %722 = vmatprep.subr.mxu0 %v3973_v0  ;;  %v704_v50 = vld [vmem:[%s5256_s2 + $0xa8] sm:$0xff] }
  0x4f   : > { %3646 = vmatmul.mubr.msk.f32.vlgmr.msra.gmra.mxu1 %vm5261_vm6, %v4235_v43  ;;  %v537_v14 = vsel %vm468_vm8, %v536_v8, 0.0  ;;  %v435_v41 = vsel %vm433_vm15, %v432_v36, %v431_v40  ;;  %723 = vmatpush1.msra.mxu0 %v696_v55 }
  0x50   : > { %3649 = vmatpush3.msk.msra.mxu1 %vm821_vm5, %v4174_v6  ;;  %3650 = vmatprep.mubr.msk.f32.mxu1 %vm3974_vm0, %v3973_v0  ;;  %v4495_v29 = vsub.s32 %v2021_v47, %v4221_v37  ;;  %v2026_v54 = vadd.s32 4294967288, %v2021_v47 }
  0x51   : > { %3653 = vmatprep.subr.mxu1 %v3973_v0  ;;  %724 = vmatprep.subr.mxu0 %v3973_v0 }
  0x53   : > { %3651 = vmatmul.mubr.msk.f32.vlgmr.msra.gmra.mxu1 %vm5261_vm6, %v4255_v49 }
  0x54   : > { %3654 = vmatpush3.msk.msra.mxu1 %vm821_vm5, %v4174_v6  ;;  %3655 = vmatprep.mubr.msk.f32.mxu1 %vm3974_vm0, %v3973_v0 }
  0x55   : > { %3658 = vmatprep.subr.mxu1 %v3973_v0 }
  0x57   : > { %3656 = vmatmul.mubr.msk.f32.vlgmr.msra.gmra.mxu1 %vm5261_vm6, %v4282_v7 }
  0x58   : > { %3659 = vmatpush3.msk.msra.mxu1 %vm821_vm5, %v4293_v9  ;;  %3660 = vmatprep.mubr.msk.f32.mxu1 %vm3974_vm0, %v3973_v0 }
  0x59   : > { %3663 = vmatprep.subr.mxu1 %v3973_v0 }
  0x5a   : > { %615 = vrot.lane.b32.xlu1 %v537_v14, %s3975_s20  ;;  %v695_v14 = vld [vmem:[%s5256_s2 + $0x60] sm:$0xff] }
  0x5b   : > { %3661 = vmatmul.mubr.msk.f32.vlgmr.msra.gmra.mxu1 %vm5261_vm6, %v4171_v3  ;;  %v462_v3 = vrot.slane %v4297_v13, 7  ;;  %725 = vmatpush1.msra.mxu0 %v695_v14  ;;  %v687_v14 = vld [vmem:[%s5256_s2 + $0x20] sm:$0xff] }
  0x5c   : > { %3664 = vmatpush3.msk.msra.mxu1 %vm821_vm5, %v4293_v9  ;;  %3665 = vmatprep.mubr.msk.f32.mxu1 %vm3974_vm0, %v3973_v0 }
  0x5d   : > { %3668 = vmatprep.subr.mxu1 %v3973_v0  ;;  %v464_v6 = vsel %vm463_vm7, %v461_v2, %v462_v3  ;;  %726 = vmatprep.subr.mxu0 %v3973_v0 }
  0x5e   : > { %631 = vrot.lane.b32.xlu1 %v541_v59, %s3976_s26  ;;  %727 = vmatpush1.msra.mxu0 %v694_v61 }
  0x5f   : > { %3666 = vmatmul.mubr.msk.f32.vlgmr.msra.gmra.mxu1 %vm5261_vm6, %v4188_v19  ;;  %v476_v19 = vrot.slane %v4295_v12, 1  ;;  %728 = vmatprep.subr.mxu0 %v3973_v0 }
  0x60   : > { %3669 = vmatpush3.msk.msra.mxu1 %vm821_vm5, %v4293_v9  ;;  %3670 = vmatprep.mubr.msk.f32.mxu1 %vm3974_vm0, %v3973_v0 }
  0x61   : > { %3673 = vmatprep.subr.mxu1 %v3973_v0  ;;  %623 = vrot.lane.b32.xlu0 %v4237_v44, %s3977_s28  ;;  %v480_v23 = vsel %vm478_vm9, %v477_v20, %v476_v19 }
  0x62   : > { %561 = vrot.lane.b32.xlu1 %v449_v1, %s3975_s20  ;;  %v490_v24 = vsel %vm486_vm13, %v480_v23, 0.0  ;;  %vm438_vm13 = vcmp.ge.s32.totalorder %v4462_v38, 0  ;;  %v1915_v1 = vld [vmem:[%s5257_s3 + $0x60] sm:$0xff]  ;;  %v692_v23 = vld [vmem:[%s5256_s2 + $0x48] sm:$0xff] }
  0x63   : > { %3671 = vmatmul.mubr.msk.f32.vlgmr.msra.gmra.mxu1 %vm5261_vm6, %v4200_v26  ;;  %v492_v26 = vrot.slane %v4297_v13, 2  ;;  %v4475_v42 = vsel %vm438_vm13, %v435_v41, 0.0  ;;  %v690_v41 = vld [vmem:[%s5256_s2 + $0x38] sm:$0xff] }
  0x64   : > { %3674 = vmatpush3.msk.msra.mxu1 %vm821_vm5, %v4293_v9  ;;  %3675 = vmatprep.mubr.msk.f32.mxu1 %vm3974_vm0, %v3973_v0 }
  0x65   : > { %3678 = vmatprep.subr.mxu1 %v3973_v0  ;;  %639 = vrot.lane.b32.xlu0 %v547_v5, %s3978_s29  ;;  %v495_v28 = vsel %vm493_vm11, %v492_v26, %v491_v25  ;;  %v4458_v35 = vsel %vm493_vm11, %v491_v25, %v492_v26 }
  0x66   : > { %569 = vrot.lane.b32.xlu1 %v464_v6, %s3977_s28  ;;  %v505_v30 = vsel %vm501_vm14, %v495_v28, 0.0  ;;  %v693_v6 = vld [vmem:[%s5256_s2 + $0x50] sm:$0xff] }
  0x67   : > { %3676 = vmatmul.mubr.msk.f32.vlgmr.msra.gmra.mxu1 %vm5261_vm6, %v4216_v34  ;;  %v4454_v34 = vsel %vm463_vm7, %v462_v3, %v461_v2  ;;  %vm2031_vm7 = vcmask 130112   ;;  %729 = vmatpush1.msra.mxu0 %v693_v6 }
  0x68   : > { %3679 = vmatpush3.msk.msra.mxu1 %vm821_vm5, %v4293_v9  ;;  %3680 = vmatprep.mubr.msk.f32.mxu1 %vm3974_vm0, %v3973_v0 }
  0x69   : > { %3683 = vmatprep.subr.mxu1 %v3973_v0  ;;  %617 = vrot.lane.b32.xlu0 %v535_v18, %s3975_s20 }
  0x6a   : > { %647 = vrot.lane.b32.xlu1 %v553_v22, %s3979_s9  ;;  %730 = vmatprep.subr.mxu0 %v3973_v0 }
  0x6b   : > { %3681 = vmatmul.mubr.msk.f32.vlgmr.msra.gmra.mxu1 %vm5261_vm6, %v4235_v43  ;;  %v527_v43 = vrot.slane %v4237_v44, 6  ;;  %731 = vmatpush1.msra.mxu0 %v692_v23 }
  0x6c   : > { %3684 = vmatpush3.msk.msra.mxu1 %vm821_vm5, %v4293_v9  ;;  %3685 = vmatprep.mubr.msk.f32.mxu1 %vm3974_vm0, %v3973_v0 }
  0x6d   : > { %3688 = vmatprep.subr.mxu1 %v3973_v0  ;;  %577 = vrot.lane.b32.xlu0 %v4297_v13, %s3976_s26  ;;  %v4492_v53 = vsel %vm448_vm10, %v527_v43, %v528_v46 }
  0x6e   : > { %625 = vrot.lane.b32.xlu1 %v4239_v45, %s3977_s28  ;;  %732 = vmatprep.subr.mxu0 %v3973_v0 }
  0x6f   : > { %3686 = vmatmul.mubr.msk.f32.vlgmr.msra.gmra.mxu1 %vm5261_vm6, %v4255_v49 }
  0x70   : > { %3689 = vmatpush3.msk.msra.mxu1 %vm821_vm5, %v4293_v9  ;;  %3690 = vmatprep.mubr.msk.f32.mxu1 %vm3974_vm0, %v3973_v0 }
  0x71   : > { %585 = vrot.lane.b32.xlu0 %v490_v24, %s3978_s29  ;;  %1935 = vmatprep.subr.mxu1 %v3973_v0 }
  0x72   : > { %633 = vrot.lane.b32.xlu1 %v544_v33, %s3976_s26 }
  0x73   : > { %3691 = vmatmul.mubr.msk.f32.vlgmr.msra.gmra.mxu1 %vm5261_vm6, %v4282_v7  ;;  %v4507_v7 = vsub.s32 %v2026_v54, %v4221_v37  ;;  %vm667_vm6 = vcmask 785408  }
  0x74   : > { %1936 = vmatpush1.msra.mxu1 %v1918_v56  ;;  %v688_v56 = vld [vmem:[%s5256_s2 + $0x28] sm:$0xff] }
  0x75   : > { %593 = vrot.lane.b32.xlu0 %v505_v30, %s3979_s9  ;;  %1937 = vmatprep.subr.mxu1 %v3973_v0  ;;  %v691_v30 = vld [vmem:[%s5256_s2 + $0x40] sm:$0xff] }
  0x76   : > { %1938 = vmatpush1.msra.mxu1 %v1917_v16  ;;  %733 = vmatpush1.msra.mxu0 %v691_v30 }
  0x77   : > { %1939 = vmatprep.subr.mxu1 %v3973_v0  ;;  %734 = vmatprep.subr.mxu0 %v3973_v0 }
  0x78   : > { %1940 = vmatpush1.msra.mxu1 %v1916_v17  ;;  %735 = vmatpush1.msra.mxu0 %v690_v41 }
  0x79   : > { %1941 = vmatprep.subr.mxu1 %v3973_v0  ;;  %736 = vmatprep.subr.mxu0 %v3973_v0 }
  0x7a   : > { %1942 = vmatpush1.msra.mxu1 %v1915_v1  ;;  %737 = vmatpush1.msra.mxu0 %v689_v52 }
  0x7b   : > { %1943 = vmatprep.subr.mxu1 %v3973_v0  ;;  %738 = vmatprep.subr.mxu0 %v3973_v0 }
  0x7c   : > { %739 = vmatpush1.msra.mxu0 %v688_v56 }
  0x7d   : > { %740 = vmatprep.subr.mxu0 %v3973_v0 }
  0x7e   : > { %741 = vmatpush1.msra.mxu0 %v687_v14 }
  0x7f   : > { %742 = vmatprep.subr.mxu0 %v3973_v0 }
  0xb5   : > { %v368_v48 = vpop.xlane.xlu1 %367  ;;  %v364_v49 = vpop.xlane.xlu0 %363 }
  0xb6   : > { %v2036_v57 = vrot.slane %v368_v48, %v4495_v29  ;;  %v2025_v58 = vrot.slane %v364_v49, %v4495_v29 }
  0xb9   : > { %v370_v8 = vpop.xlane.xlu1 %369  ;;  %v366_v9 = vpop.xlane.xlu0 %365 }
  0xba   : > { %v2040_v59 = vrot.slane %v370_v8, %v4507_v7  ;;  %v2030_v60 = vrot.slane %v366_v9, %v4507_v7 }
  0xbc   : > { %v2041_v2 = vsel %vm2031_vm7, %v2040_v59, %v2036_v57  ;;  %v2032_v3 = vsel %vm2031_vm7, %v2030_v60, %v2025_v58  ;;  %v686_v60 = vld [vmem:[%s5256_s2 + $0x18] sm:$0xff] }
  0xbd   : > { %v374_v4 = vpop.xlane.xlu1 %373  ;;  %v372_v5 = vpop.xlane.xlu0 %371  ;;  %v2060_v18 = vsel %vm811_vm2, %v2041_v2, %v2032_v3  ;;  %743 = vmatpush1.msra.mxu0 %v686_v60  ;;  %v1913_v60 = vld [vmem:[%s5257_s3 + $0x50] sm:$0xff] }
  0xbe   : > { %v2049_v21 = vrot.slane %v374_v4, %v4507_v7  ;;  %v2045_v22 = vrot.slane %v372_v5, %v4495_v29  ;;  %v685_v4 = vld [vmem:[%s5256_s2 + $0x10] sm:$0xff]  ;;  %744 = vmatprep.subr.mxu0 %v3973_v0 }
  0xbf   : > { %745 = vmatpush1.msra.mxu0 %v685_v4  ;;  %v1911_v4 = vld [vmem:[%s5257_s3 + $0x40] sm:$0xff] }
  0xc0   : > { %v2050_v24 = vsel %vm2031_vm7, %v2049_v21, %v2045_v22  ;;  %v684_v22 = vld [vmem:[%s5256_s2 + $0x8] sm:$0xff]  ;;  %746 = vmatprep.subr.mxu0 %v3973_v0 }
  0xc1   : > { %v2061_v25 = vsel %vm813_vm3, %v2050_v24, %v2060_v18  ;;  %v378_v26 = vpop.xlane.xlu1 %377  ;;  %v376_v28 = vpop.xlane.xlu0 %375  ;;  %747 = vmatpush1.msra.mxu0 %v684_v22 }
  0xc2   : > { %v2058_v32 = vrot.slane %v378_v26, %v4507_v7  ;;  %v2054_v33 = vrot.slane %v376_v28, %v4495_v29  ;;  %748 = vmatprep.subr.mxu0 %v3973_v0 }
  0xc4   : > { %v2059_v47 = vsel %vm2031_vm7, %v2058_v32, %v2054_v33 }
  0xc5   : > { %v4559_v48 = vsel %vm815_vm4, %v2059_v47, %v2061_v25  ;;  %v382_v49 = vpop.xlane.xlu1 %381  ;;  %v380_v51 = vpop.xlane.xlu0 %379 }
  0xc6   : > { %v396_v54 = vmul.f32 0.0625, %v382_v49  ;;  %v395_v55 = vmul.f32 0.0625, %v380_v51 }
  0xc8   : > { %v2570_v57 = vrot.slane %v396_v54, %v4507_v7  ;;  %v2566_v58 = vrot.slane %v395_v55, %v4495_v29  ;;  %v434_v55 = vsel %vm433_vm15, %v431_v40, %v432_v36 }
  0xca   : > { %v386_v8 = vpop.xlane.xlu1 %385  ;;  %v2571_v16 = vsel %vm2031_vm7, %v2570_v57, %v2566_v58 }
  0xcb   : > { %v384_v9 = vpop.xlane.xlu0 %383  ;;  %v398_v17 = vmul.f32 0.0625, %v386_v8 }
  0xcc   : > { %v397_v59 = vmul.f32 0.0625, %v384_v9 }
  0xcd   : > { %v2579_v61 = vrot.slane %v398_v17, %v4507_v7 }
  0xce   : > { %v2575_v1 = vrot.slane %v397_v59, %v4495_v29  ;;  %v390_v2 = vpop.xlane.xlu1 %389  ;;  %v683_v59 = vld [vmem:[%s5256_s2] sm:$0xff] }
  0xcf   : > { %v388_v3 = vpop.xlane.xlu0 %387  ;;  %v400_v6 = vmul.f32 0.0625, %v390_v2  ;;  %749 = vmatpush1.msra.mxu0 %v683_v59  ;;  %v1912_v2 = vld [vmem:[%s5257_s3 + $0x48] sm:$0xff]  ;;  %v521_v59 = vrot.slane %v4237_v44, 5 }
  0xd0   : > { %v2580_v5 = vsel %vm2031_vm7, %v2579_v61, %v2575_v1  ;;  %v399_v18 = vmul.f32 0.0625, %v388_v3  ;;  %758 = vmatprep.subr.mxu0 %v3973_v0  ;;  %v710_v1 = vld [vmem:[%s5256_s2 + $0xd8] sm:$0xff]  ;;  %v709_v3 = vld [vmem:[%s5256_s2 + $0xd0] sm:$0xff] }
  0xd1   : > { %v2599_v21 = vsel %vm811_vm2, %v2580_v5, %v2571_v16  ;;  %v2588_v23 = vrot.slane %v400_v6, %v4507_v7  ;;  %vm655_vm2 = vcmask 261120   ;;  %759 = vmatpush2.msra.mxu0 %v710_v1  ;;  %v708_v6 = vld [vmem:[%s5256_s2 + $0xc8] sm:$0xff]  ;;  %v1929_v1 = vld [vmem:[%s5257_s3 + $0xd0] sm:$0xff] }
  0xd2   : > { %v2584_v24 = vrot.slane %v399_v18, %v4495_v29  ;;  %v394_v25 = vpop.xlane.xlu1 %393  ;;  %760 = vmatprep.subr.mxu0 %v3973_v0  ;;  %v1910_v18 = vld [vmem:[%s5257_s3 + $0x38] sm:$0xff] }
  0xd3   : > { %v392_v26 = vpop.xlane.xlu0 %391  ;;  %v402_v30 = vmul.f32 0.0625, %v394_v25  ;;  %761 = vmatpush2.msra.mxu0 %v709_v3 }
  0xd4   : > { %v2589_v28 = vsel %vm2031_vm7, %v2588_v23, %v2584_v24  ;;  %v401_v32 = vmul.f32 0.0625, %v392_v26  ;;  %762 = vmatprep.subr.mxu0 %v3973_v0  ;;  %v707_v23 = vld [vmem:[%s5256_s2 + $0xc0] sm:$0xff]  ;;  %v1909_v24 = vld [vmem:[%s5257_s3 + $0x30] sm:$0xff] }
  0xd5   : > { %v2600_v33 = vsel %vm813_vm3, %v2589_v28, %v2599_v21  ;;  %v2597_v41 = vrot.slane %v402_v30, %v4507_v7  ;;  %v451_v7 = vadd.s32 4294967294, %v4242_v39  ;;  %763 = vmatpush2.msra.mxu0 %v708_v6  ;;  %v1908_v28 = vld [vmem:[%s5257_s3 + $0x28] sm:$0xff] }
  0xd6   : > { %v2593_v47 = vrot.slane %v401_v32, %v4495_v29  ;;  %v616_v49 = vpop.permute.xlu1 %615  ;;  %v530_v29 = vsel %vm448_vm10, %v528_v46, %v527_v43  ;;  %vm664_vm10 = vcmask 654336   ;;  %v1914_v46 = vld [vmem:[%s5257_s3 + $0x58] sm:$0xff]  ;;  %764 = vmatprep.subr.mxu0 %v3973_v0  ;;  %v474_v32 = vsel %vm468_vm8, %v4454_v34, 0.0  ;;  %v1928_v6 = vld [vmem:[%s5257_s3 + $0xc8] sm:$0xff] }
  0xd7   : > { %vm453_vm3 = vcmp.ge.s32.totalorder %v451_v7, 0  ;;  %v624_v9 = vpop.permute.xlu0 %623  ;;  %1944 = vmatpush1.msra.mxu1 %v1914_v46  ;;  %765 = vmatpush2.msra.mxu0 %v707_v23  ;;  %v1930_v46 = vld [vmem:[%s5257_s3 + $0xd8] sm:$0xff] }
  0xd8   : > { %v2598_v51 = vsel %vm2031_vm7, %v2597_v41, %v2593_v47  ;;  %v531_v36 = vsel %vm453_vm3, %v530_v29, 0.0  ;;  %vm661_vm7 = vcmask 523264   ;;  %1945 = vmatprep.subr.mxu1 %v3973_v0  ;;  %v459_v22 = vsel %vm453_vm3, %v4441_v31, 0.0  ;;  %766 = vmatprep.subr.mxu0 %v3973_v0  ;;  %v706_v31 = vld [vmem:[%s5256_s2 + $0xb8] sm:$0xff]  ;;  %v1907_v41 = vld [vmem:[%s5257_s3 + $0x20] sm:$0xff]  ;;  %v1904_v29 = vld [vmem:[%s5257_s3 + $0x8] sm:$0xff] }
  0xd9   : > { %v4602_v52 = vsel %vm815_vm4, %v2598_v51, %v2600_v33  ;;  %v673_v40 = vsel %vm272_vm1, %v531_v36, %v616_v49  ;;  %vm658_vm4 = vcmask 392192   ;;  %1946 = vmatpush1.msra.mxu1 %v1913_v60  ;;  %767 = vmatpush2.msra.mxu0 %v706_v31  ;;  %v705_v33 = vld [vmem:[%s5256_s2 + $0xb0] sm:$0xff]  ;;  %v1906_v49 = vld [vmem:[%s5257_s3 + $0x18] sm:$0xff]  ;;  %v479_v36 = vsel %vm478_vm9, %v476_v19, %v477_v20  ;;  %v700_v19 = vld [vmem:[%s5256_s2 + $0x88] sm:$0xff] }
  0xda   : > { %v632_v54 = vpop.permute.xlu1 %631  ;;  %v675_v39 = vsel %vm655_vm2, %v673_v40, %v624_v9  ;;  %1947 = vmatprep.subr.mxu1 %v3973_v0  ;;  %768 = vmatprep.subr.mxu0 %v3973_v0  ;;  %v701_v40 = vld [vmem:[%s5256_s2 + $0x90] sm:$0xff]  ;;  %v1903_v9 = vld [vmem:[%s5257_s3] sm:$0xff]  ;;  %v522_v60 = vrot.slane %v4239_v45, 5  ;;  %vm670_vm9 = vcmask 916480  }
  0xdb   : > { %v677_v14 = vsel %vm658_vm4, %v675_v39, %v632_v54  ;;  %v640_v16 = vpop.permute.xlu0 %639  ;;  %1948 = vmatpush1.msra.mxu1 %v1912_v2  ;;  %769 = vmatpush2.msra.mxu0 %v705_v33  ;;  %v703_v54 = vld [vmem:[%s5256_s2 + $0xa0] sm:$0xff] }
  0xdc   : > { %v679_v43 = vsel %vm661_vm7, %v677_v14, %v640_v16  ;;  %1949 = vmatprep.subr.mxu1 %v3973_v0  ;;  %770 = vmatprep.subr.mxu0 %v3973_v0  ;;  %v506_v16 = vrot.slane %v4295_v12, 3  ;;  %v1923_v33 = vld [vmem:[%s5257_s3 + $0xa0] sm:$0xff] }
  0xdd   : > { %1950 = vmatpush1.msra.mxu1 %v1911_v4  ;;  %771 = vmatpush2.msra.mxu0 %v704_v50 }
  0xde   : > { %v562_v56 = vpop.permute.xlu1 %561  ;;  %1951 = vmatprep.subr.mxu1 %v3973_v0  ;;  %772 = vmatprep.subr.mxu0 %v3973_v0 }
  0xdf   : > { %v654_v57 = vsel %vm272_vm1, %v434_v55, %v562_v56  ;;  %1952 = vmatpush1.msra.mxu1 %v1910_v18  ;;  %v1905_v55 = vld [vmem:[%s5257_s3 + $0x10] sm:$0xff]  ;;  %773 = vmatpush2.msra.mxu0 %v703_v54 }
  0xe0   : > { %1953 = vmatprep.subr.mxu1 %v3973_v0  ;;  %774 = vmatprep.subr.mxu0 %v3973_v0 }
  0xe1   : > { %1954 = vmatpush1.msra.mxu1 %v1909_v24 }
  0xe2   : > { %v570_v58 = vpop.permute.xlu1 %569  ;;  %1955 = vmatprep.subr.mxu1 %v3973_v0 }
  0xe3   : > { %v4619_v8 = vsel %vm655_vm2, %v654_v57, %v570_v58  ;;  %1956 = vmatpush1.msra.mxu1 %v1908_v28  ;;  %v702_v57 = vld [vmem:[%s5256_s2 + $0x98] sm:$0xff] }
  0xe4   : > { %1957 = vmatprep.subr.mxu1 %v3973_v0  ;;  %775 = vmatpush2.msra.mxu0 %v702_v57 }
  0xe5   : > { %1958 = vmatpush1.msra.mxu1 %v1907_v41  ;;  %776 = vmatprep.subr.mxu0 %v3973_v0 }
  0xe6   : > { %v648_v17 = vpop.permute.xlu1 %647  ;;  %1959 = vmatprep.subr.mxu1 %v3973_v0  ;;  %777 = vmatpush2.msra.mxu0 %v701_v40 }
  0xe7   : > { %v681_v61 = vsel %vm664_vm10, %v679_v43, %v648_v17  ;;  %1960 = vmatpush1.msra.mxu1 %v1906_v49  ;;  %v507_v43 = vrot.slane %v4297_v13, 3  ;;  %778 = vmatprep.subr.mxu0 %v3973_v0  ;;  %v699_v17 = vld [vmem:[%s5256_s2 + $0x80] sm:$0xff]  ;;  %v523_v13 = vsel %vm433_vm15, %v521_v59, %v522_v60 }
  0xe8   : > { %3488 = vmatprep.mubr.msk.f32.mxu0 %vm667_vm6, %v681_v61  ;;  %1961 = vmatprep.subr.mxu1 %v3973_v0 }
  0xe9   : > { %1962 = vmatpush1.msra.mxu1 %v1905_v55  ;;  %779 = vmatpush2.msra.mxu0 %v700_v19  ;;  %v509_v4 = vsel %vm508_vm12, %v506_v16, %v507_v43  ;;  %v1919_v55 = vld [vmem:[%s5257_s3 + $0x80] sm:$0xff] }
  0xea   : > { %1963 = vmatprep.subr.mxu1 %v3973_v0  ;;  %780 = vmatprep.subr.mxu0 %v3973_v0 }
  0xeb   : > { %1964 = vmatpush1.msra.mxu1 %v1904_v29  ;;  %781 = vmatpush2.msra.mxu0 %v699_v17  ;;  %v548_v29 = vsel %vm493_vm11, %v546_v63, %v545_v62  ;;  %v554_v62 = vsel %vm508_vm12, %v552_v15, %v551_v11  ;;  %v618_v11 = vpop.permute.xlu0 %617  ;;  %v626_v15 = vpop.permute.xlu1 %625  ;;  %vm5266_vm11 = vcmask 31744  }
  0xec   : > { %1965 = vmatprep.subr.mxu1 %v3973_v0  ;;  %3728 = vmatprep.subr.mxu0 %v3973_v0  ;;  %vm5271_vm3 = vmmov %vm5266_vm11 }
  0xed   : > { %1966 = vmatpush1.msra.mxu1 %v1903_v9  ;;  %v550_v9 = vsel %vm501_vm14, %v548_v29, 0.0  ;;  %vm5268_vm14 = vmmov %vm5266_vm11 }
  0xee   : > { %1975 = vmatprep.subr.mxu1 %v3973_v0 }
  0xef   : > { %1976 = vmatpush2.msra.mxu1 %v1930_v46  ;;  %v578_v19 = vpop.permute.xlu0 %577 }
  0xf0   : > { %1977 = vmatprep.subr.mxu1 %v3973_v0 }
  0xf1   : > { %1978 = vmatpush2.msra.mxu1 %v1929_v1 }
  0xf2   : > { %1979 = vmatprep.subr.mxu1 %v3973_v0 }
  0xf3   : > { %1980 = vmatpush2.msra.mxu1 %v1928_v6 }
  0xf4   : > { %1981 = vmatprep.subr.mxu1 %v3973_v0 }
  0xff   : > { %v4653_v5 = vpop.f32.mrf.mxu1 }
 0x101   : > { %v3627_v21 = vpop.f32.mrf.mxu1 }
 0x102   : > { %v1927_v21 = vld [vmem:[%s5257_s3 + $0xc0] sm:$0xff] }
 0x103   : > { %v965_v25 = vpop.f32.mrf.mxu1  ;;  %1982 = vmatpush2.msra.mxu1 %v1927_v21 }
 0x104   : > { %v3825_v26 = vpack.i.bf16 %v459_v22, %v965_v25  ;;  %v1926_v25 = vld [vmem:[%s5257_s3 + $0xb8] sm:$0xff]  ;;  %1983 = vmatprep.subr.mxu1 %v3973_v0 }
 0x105   : > { %v3632_v30 = vpop.f32.mrf.mxu1  ;;  %1984 = vmatpush2.msra.mxu1 %v1926_v25 }
 0x106   : > { %3826 = vrot.lane.b32.xlu0 %v3825_v26, %s3975_s20  ;;  %v1925_v26 = vld [vmem:[%s5257_s3 + $0xb0] sm:$0xff]  ;;  %1985 = vmatprep.subr.mxu1 %v3973_v0  ;;  %v1924_v30 = vld [vmem:[%s5257_s3 + $0xa8] sm:$0xff] }
 0x107   : > { %v1040_v47 = vpop.f32.mrf.mxu1  ;;  %1986 = vmatpush2.msra.mxu1 %v1925_v26 }
 0x108   : > { %v3830_v34 = vpack.i.bf16 %v474_v32, %v1040_v47  ;;  %1987 = vmatprep.subr.mxu1 %v3973_v0  ;;  %v1922_v47 = vld [vmem:[%s5257_s3 + $0x98] sm:$0xff] }
 0x109   : > { %v3637_v51 = vpop.f32.mrf.mxu1  ;;  %1988 = vmatpush2.msra.mxu1 %v1924_v30 }
 0x10a   : > { %3831 = vrot.lane.b32.xlu1 %v3830_v34, %s3977_s28  ;;  %1989 = vmatprep.subr.mxu1 %v3973_v0  ;;  %v1921_v34 = vld [vmem:[%s5257_s3 + $0x90] sm:$0xff]  ;;  %v1920_v51 = vld [vmem:[%s5257_s3 + $0x88] sm:$0xff] }
 0x10b   : > { %v1115_v56 = vpop.f32.mrf.mxu1  ;;  %1990 = vmatpush2.msra.mxu1 %v1923_v33 }
 0x10c   : > { %v3835_v7 = vpack.i.bf16 %v4295_v12, %v1115_v56  ;;  %1991 = vmatprep.subr.mxu1 %v3973_v0 }
 0x10d   : > { %v3642_v58 = vpop.f32.mrf.mxu1  ;;  %1992 = vmatpush2.msra.mxu1 %v1922_v47 }
 0x10e   : > { %3836 = vrot.lane.b32.xlu1 %v3835_v7, %s3976_s26  ;;  %1993 = vmatprep.subr.mxu1 %v3973_v0  ;;  %v512_v58 = vadd.s32 3, %v4361_v10 }
 0x10f   : > { %v1190_v39 = vpop.f32.mrf.mxu1  ;;  %1994 = vmatpush2.msra.mxu1 %v1921_v34 }
 0x110   : > { %v3840_v20 = vpack.i.bf16 %v479_v36, %v1190_v39  ;;  %1995 = vmatprep.subr.mxu1 %v3973_v0  ;;  %v510_v39 = vsel %vm508_vm12, %v507_v43, %v506_v16  ;;  %vm516_vm8 = vcmp.lt.s32.totalorder %v512_v58, 16  ;;  %vm5267_vm12 = vmmov %vm5266_vm11 }
 0x111   : > { %v3647_v14 = vpop.f32.mrf.mxu1  ;;  %1996 = vmatpush2.msra.mxu1 %v1920_v51  ;;  %v520_v12 = vsel %vm516_vm8, %v510_v39, 0.0  ;;  %v556_v27 = vsel %vm516_vm8, %v554_v62, 0.0  ;;  %vm5272_vm8 = vmmov %vm5271_vm3 }
 0x112   : > { %3841 = vrot.lane.b32.xlu1 %v3840_v20, %s3978_s29  ;;  %1997 = vmatprep.subr.mxu1 %v3973_v0  ;;  %v634_v20 = vpop.permute.xlu1 %633  ;;  %v586_v14 = vpop.permute.xlu0 %585 }
 0x113   : > { %v1265_v61 = vpop.f32.mrf.mxu1  ;;  %1998 = vmatpush2.msra.mxu1 %v1919_v55 }
 0x114   : > { %v3845_v2 = vpack.i.bf16 %v4458_v35, %v1265_v61  ;;  %v524_v35 = vsel %vm433_vm15, %v522_v60, %v521_v59  ;;  %3693 = vmatprep.subr.mxu1 %v3973_v0  ;;  %vm5269_vm15 = vmmov %vm5266_vm11 }
 0x115   : > { %v3652_v3 = vpop.f32.mrf.mxu1  ;;  %v525_v24 = vsel %vm438_vm13, %v524_v35, 0.0  ;;  %vm5270_vm13 = vmmov %vm5266_vm11 }
 0x116   : > { %3846 = vrot.lane.b32.xlu0 %v3845_v2, %s3979_s9  ;;  %v4854_v43 = vpop.permute.xlu0 %593 }
 0x117   : > { %v1340_v18 = vpop.f32.mrf.mxu1 }
 0x118   : > { %v3850_v22 = vpack.i.bf16 %v509_v4, %v1340_v18 }
 0x119   : > { %v3657_v23 = vpop.f32.mrf.mxu1 }
 0x11a   : > { %3851 = vrot.lane.b32.xlu1 %v3850_v22, %s3980_s18 }
 0x11b   : > { %v1419_v31 = vpop.f32.mrf.mxu1 }
 0x11c   : > { %v3855_v28 = vpack.i.bf16 %v525_v24, %v1419_v31 }
 0x11d   : > { %v3662_v38 = vpop.f32.mrf.mxu1 }
 0x11e   : > { %3856 = vrot.lane.b32.xlu0 %v3855_v28, %s5262_s14 }
 0x11f   : > { %v4794_v32 = vpop.f32.mrf.mxu1 }
 0x121   : > { %v3667_v41 = vpop.f32.mrf.mxu1 }
 0x123   : > { %v1559_v50 = vpop.f32.mrf.mxu1 }
 0x124   : > { %1872 = vrot.lane.b32.xlu1 %v1559_v50, %s3975_s20 }
 0x125   : > { %v3672_v49 = vpop.f32.mrf.mxu1 }
 0x126   : > { %v674_v49 = vsel %vm272_vm1, %v4492_v53, %v618_v11 }
 0x127   : > { %v1629_v54 = vpop.f32.mrf.mxu1  ;;  %v676_v58 = vsel %vm655_vm2, %v674_v49, %v626_v15 }
 0x128   : > { %1876 = vrot.lane.b32.xlu0 %v1629_v54, %s3977_s28 }
 0x129   : > { %v3677_v56 = vpop.f32.mrf.mxu1 }
 0x12b   : > { %v1699_v57 = vpop.f32.mrf.mxu1 }
 0x12c   : > { %1880 = vrot.lane.b32.xlu0 %v1699_v57, %s3976_s26 }
 0x12d   : > { %v3682_v7 = vpop.f32.mrf.mxu1 }
 0x12f   : > { %v1769_v36 = vpop.f32.mrf.mxu1 }
 0x130   : > { %1884 = vrot.lane.b32.xlu1 %v1769_v36, %s3978_s29 }
 0x131   : > { %v3687_v40 = vpop.f32.mrf.mxu1 }
 0x133   : > { %v1839_v63 = vpop.f32.mrf.mxu1 }
 0x134   : > { %1888 = vrot.lane.b32.xlu0 %v1839_v63, %s3979_s9  ;;  %641 = vrot.lane.b32.xlu1 %v550_v9, %s3978_s29 }
 0x135   : > { %v3692_v10 = vpop.f32.mrf.mxu1 }
 0x136   : > { %v678_v10 = vsel %vm658_vm4, %v676_v58, %v634_v20 }
 0x138   : > { %601 = vrot.lane.b32.xlu0 %v520_v12, %s3980_s18  ;;  %649 = vrot.lane.b32.xlu1 %v556_v27, %s3979_s9 }
 0x13c   : > { %609 = vrot.lane.b32.xlu0 %v523_v13, %s5262_s14 }
 0x178   : > { %v3827_v17 = vpop.permute.xlu0 %3826 }
 0x179   : > { %v3829_v1 = vunpack.i.h.bf16 %v3827_v17  ;;  %v3828_v26 = vunpack.i.l.bf16 %v3827_v17  ;;  %v3879_v17 = vld [vmem:[%s5259_s5 + $0xc] sm:$0xf] }
 0x17b   : > { %v653_v59 = vsel %vm272_vm1, %v4475_v42, %v3829_v1  ;;  %v1891_v41 = vsel %vm272_vm1, %v4653_v5, %v3828_v26  ;;  %v3881_v1 = vld [vmem:[%s5259_s5 + $0x14] sm:$0xf] }
 0x17c   : > { %v3832_v16 = vpop.permute.xlu1 %3831  ;;  %v3156_v26 = vld [vmem:[%s5258_s4 + $0x10] sm:$0xff] }
 0x17d   : > { %v3834_v45 = vunpack.i.h.bf16 %v3832_v16  ;;  %v3833_v38 = vunpack.i.l.bf16 %v3832_v16 }
 0x17f   : > { %v656_v6 = vsel %vm655_vm2, %v653_v59, %v3834_v45  ;;  %v1892_v51 = vsel %vm655_vm2, %v1891_v41, %v3833_v38  ;;  %v3882_v45 = vld [vmem:[%s5259_s5 + $0x18] sm:$0xf]  ;;  %v3163_v59 = vld [vmem:[%s5258_s4 + $0x48] sm:$0xff] }
 0x180   : > { %v3837_v46 = vpop.permute.xlu1 %3836 }
 0x181   : > { %v3839_v44 = vunpack.i.h.bf16 %v3837_v46  ;;  %v3838_v30 = vunpack.i.l.bf16 %v3837_v46  ;;  %v3878_v46 = vld [vmem:[%s5259_s5 + $0x8] sm:$0xf] }
 0x183   : > { %v659_v18 = vsel %vm658_vm4, %v656_v6, %v3839_v44  ;;  %v1893_v56 = vsel %vm658_vm4, %v1892_v51, %v3838_v30  ;;  %v3166_v44 = vld [vmem:[%s5258_s4 + $0x60] sm:$0xff]  ;;  %v3161_v6 = vld [vmem:[%s5258_s4 + $0x38] sm:$0xff] }
 0x184   : > { %v3842_v61 = vpop.permute.xlu1 %3841 }
 0x185   : > { %v3844_v3 = vunpack.i.h.bf16 %v3842_v61  ;;  %v3843_v33 = vunpack.i.l.bf16 %v3842_v61  ;;  %v3880_v61 = vld [vmem:[%s5259_s5 + $0x10] sm:$0xf] }
 0x187   : > { %v662_v21 = vsel %vm661_vm7, %v659_v18, %v3844_v3  ;;  %v1894_v29 = vsel %vm661_vm7, %v1893_v56, %v3843_v33  ;;  %v3165_v3 = vld [vmem:[%s5258_s4 + $0x58] sm:$0xff]  ;;  %v3159_v18 = vld [vmem:[%s5258_s4 + $0x28] sm:$0xff] }
 0x188   : > { %v3847_v2 = vpop.permute.xlu0 %3846  ;;  %v3179_v56 = vld [vmem:[%s5258_s4 + $0xc8] sm:$0xff] }
 0x189   : > { %v3849_v60 = vunpack.i.h.bf16 %v3847_v2  ;;  %v3848_v47 = vunpack.i.l.bf16 %v3847_v2  ;;  %v3167_v2 = vld [vmem:[%s5258_s4 + $0x68] sm:$0xff] }
 0x18b   : > { %v665_v24 = vsel %vm664_vm10, %v662_v21, %v3849_v60  ;;  %v1895_v36 = vsel %vm664_vm10, %v1894_v29, %v3848_v47  ;;  %v3162_v60 = vld [vmem:[%s5258_s4 + $0x40] sm:$0xff] }
 0x18c   : > { %v3852_v4 = vpop.permute.xlu1 %3851  ;;  %v3158_v21 = vld [vmem:[%s5258_s4 + $0x20] sm:$0xff] }
 0x18d   : > { %v3854_v35 = vunpack.i.h.bf16 %v3852_v4  ;;  %v3853_v54 = vunpack.i.l.bf16 %v3852_v4  ;;  %v3164_v4 = vld [vmem:[%s5258_s4 + $0x50] sm:$0xff] }
 0x18f   : > { %v668_v25 = vsel %vm667_vm6, %v665_v24, %v3854_v35  ;;  %v1896_v62 = vsel %vm667_vm6, %v1895_v36, %v3853_v54  ;;  %v3160_v35 = vld [vmem:[%s5258_s4 + $0x30] sm:$0xff] }
 0x190   : > { %v3857_v22 = vpop.permute.xlu0 %3856 }
 0x191   : > { %v3859_v23 = vunpack.i.h.bf16 %v3857_v22  ;;  %v3858_v57 = vunpack.i.l.bf16 %v3857_v22  ;;  %v3157_v22 = vld [vmem:[%s5258_s4 + $0x18] sm:$0xff] }
 0x193   : > { %v671_v31 = vsel %vm670_vm9, %v668_v25, %v3859_v23  ;;  %v1897_v63 = vsel %vm670_vm9, %v1896_v62, %v3858_v57  ;;  %v711_v25 = vstv %s403_s12 }
 0x194   : > { %783 = vmatmul.mubr.f32.vlgmr.msra.gmra.mxu0 %v671_v31  ;;  %v1931_v31 = vstv %s3492_s13 }
 0x195   : > { %3729 = vmatpush3.msk.msra.mxu0 %vm821_vm5, %v4602_v52 }
 0x196   : > { %3733 = vmatprep.subr.mxu0 %v3973_v0  ;;  %v1873_v28 = vpop.permute.xlu1 %1872 }
 0x197   : > { %v1898_v55 = vsel %vm272_vm1, %v4794_v32, %v1873_v28  ;;  %v660_v32 = vsel %vm658_vm4, %v4619_v8, %v578_v19  ;;  %v3876_v19 = vld [vmem:[%s5259_s5] sm:$0xf]  ;;  %v3155_v28 = vld [vmem:[%s5258_s4 + $0x8] sm:$0xff] }
 0x198   : > { %v663_v12 = vsel %vm661_vm7, %v660_v32, %v586_v14 }
 0x199   : > { %v666_v15 = vsel %vm664_vm10, %v663_v12, %v4854_v43  ;;  %v3877_v43 = vld [vmem:[%s5259_s5 + $0x4] sm:$0xf] }
 0x19a   : > { %v1877_v42 = vpop.permute.xlu0 %1876 }
 0x19b   : > { %v1899_v7 = vsel %vm655_vm2, %v1898_v55, %v1877_v42  ;;  %v3180_v55 = vld [vmem:[%s5258_s4 + $0xd0] sm:$0xff] }
 0x19e   : > { %v1881_v50 = vpop.permute.xlu0 %1880 }
 0x19f   : > { %v1900_v5 = vsel %vm658_vm4, %v1899_v7, %v1881_v50  ;;  %v3154_v50 = vld [vmem:[%s5258_s4] sm:$0xff] }
 0x1a2   : > { %v1885_v34 = vpop.permute.xlu1 %1884 }
 0x1a3   : > { %v1901_v53 = vsel %vm661_vm7, %v1900_v5, %v1885_v34  ;;  %v3181_v34 = vld [vmem:[%s5258_s4 + $0xd8] sm:$0xff] }
 0x1a6   : > { %v1889_v40 = vpop.permute.xlu0 %1888  ;;  %v642_v9 = vpop.permute.xlu1 %641 }
 0x1a7   : > { %v1902_v39 = vsel %vm664_vm10, %v1901_v53, %v1889_v40  ;;  %v680_v27 = vsel %vm661_vm7, %v678_v10, %v642_v9  ;;  %v3178_v53 = vld [vmem:[%s5258_s4 + $0xc0] sm:$0xff]  ;;  %v3177_v40 = vld [vmem:[%s5258_s4 + $0xb8] sm:$0xff]  ;;  %v3175_v10 = vld [vmem:[%s5258_s4 + $0xa8] sm:$0xff] }
 0x1a8   : > { %3527 = vmatprep.mubr.msk.f32.mxu1 %vm667_vm6, %v1902_v39 }
 0x1a9   : > { %2000 = vmatmul.mubr.f32.vlgmr.msra.gmra.mxu1 %v1897_v63  ;;  %v3176_v63 = vld [vmem:[%s5258_s4 + $0xb0] sm:$0xff] }
 0x1aa   : > { %3694 = vmatpush3.msk.msra.mxu1 %vm821_vm5, %v4559_v48  ;;  %v602_v13 = vpop.permute.xlu0 %601  ;;  %v650_v8 = vpop.permute.xlu1 %649  ;;  %3695 = vmatprep.mubr.msk.f32.mxu1 %vm3974_vm0, %v3973_v0 }
 0x1ab   : > { %v682_v11 = vsel %vm664_vm10, %v680_v27, %v650_v8  ;;  %3698 = vmatprep.subr.mxu1 %v3973_v0  ;;  %v669_v20 = vsel %vm667_vm6, %v666_v15, %v602_v13 }
 0x1ac   : > { %3489 = vmatprep.mubr.msk.f32.mxu0 %vm667_vm6, %v682_v11 }
 0x1ad   : > { %3696 = vmatmul.mubr.msk.f32.vlgmr.msra.gmra.mxu1 %vm5266_vm11, %v3876_v19  ;;  %vm5273_vm11 = vmmov %vm5271_vm3 }
 0x1ae   : > { %3699 = vmatpush3.msk.msra.mxu1 %vm821_vm5, %v4559_v48  ;;  %v610_v14 = vpop.permute.xlu0 %609  ;;  %3700 = vmatprep.mubr.msk.f32.mxu1 %vm3974_vm0, %v3973_v0 }
 0x1af   : > { %v672_v16 = vsel %vm670_vm9, %v669_v20, %v610_v14  ;;  %3703 = vmatprep.subr.mxu1 %v3973_v0  ;;  %v3174_v14 = vld [vmem:[%s5258_s4 + $0xa0] sm:$0xff] }
 0x1b0   : > { %788 = vmatmul.mubr.f32.gmra.mxu0 %v672_v16 }
 0x1b1   : > { %3701 = vmatmul.mubr.msk.f32.vlgmr.msra.gmra.mxu1 %vm5267_vm12, %v3877_v43  ;;  %3730 = vmatprep.mubr.msk.f32.mxu0 %vm3974_vm0, %v3973_v0  ;;  %vm5274_vm12 = vmmov %vm5271_vm3 }
 0x1b2   : > { %3704 = vmatpush3.msk.msra.mxu1 %vm821_vm5, %v4559_v48  ;;  %3705 = vmatprep.mubr.msk.f32.mxu1 %vm3974_vm0, %v3973_v0 }
 0x1b3   : > { %3708 = vmatprep.subr.mxu1 %v3973_v0 }
 0x1b4   : > { %3731 = vmatmul.mubr.msk.f32.vlgmr.msra.gmra.mxu0 %vm5268_vm14, %v3876_v19  ;;  %vm5275_vm14 = vmmov %vm5271_vm3 }
 0x1b5   : > { %3734 = vmatpush3.msk.msra.mxu0 %vm821_vm5, %v4602_v52  ;;  %3706 = vmatmul.mubr.msk.f32.vlgmr.msra.gmra.mxu1 %vm5269_vm15, %v3878_v46  ;;  %vm5276_vm15 = vmmov %vm5271_vm3 }
 0x1b6   : > { %3709 = vmatpush3.msk.msra.mxu1 %vm821_vm5, %v4559_v48  ;;  %3735 = vmatprep.mubr.msk.f32.mxu0 %vm3974_vm0, %v3973_v0 }
 0x1b7   : > { %3738 = vmatprep.subr.mxu0 %v3973_v0  ;;  %3710 = vmatprep.mubr.msk.f32.mxu1 %vm3974_vm0, %v3973_v0 }
 0x1b8   : > { %3713 = vmatprep.subr.mxu1 %v3973_v0  ;;  %3736 = vmatmul.mubr.msk.f32.vlgmr.msra.gmra.mxu0 %vm5270_vm13, %v3877_v43  ;;  %vm5277_vm13 = vmmov %vm5271_vm3 }
 0x1b9   : > { %3739 = vmatpush3.msk.msra.mxu0 %vm821_vm5, %v4602_v52  ;;  %3711 = vmatmul.mubr.msk.f32.vlgmr.msra.gmra.mxu1 %vm5271_vm3, %v3879_v17 }
 0x1ba   : > { %3714 = vmatpush3.msk.msra.mxu1 %vm821_vm5, %v4559_v48  ;;  %3740 = vmatprep.mubr.msk.f32.mxu0 %vm3974_vm0, %v3973_v0 }
 0x1bb   : > { %3743 = vmatprep.subr.mxu0 %v3973_v0  ;;  %3715 = vmatprep.mubr.msk.f32.mxu1 %vm3974_vm0, %v3973_v0 }
 0x1bc   : > { %3718 = vmatprep.subr.mxu1 %v3973_v0  ;;  %3741 = vmatmul.mubr.msk.f32.vlgmr.msra.gmra.mxu0 %vm5272_vm8, %v3878_v46  ;;  %vm5278_vm8 = vmmov %vm5271_vm3  ;;  %v3173_v46 = vld [vmem:[%s5258_s4 + $0x98] sm:$0xff] }
 0x1bd   : > { %3744 = vmatpush3.msk.msra.mxu0 %vm821_vm5, %v4602_v52  ;;  %3716 = vmatmul.mubr.msk.f32.vlgmr.msra.gmra.mxu1 %vm5273_vm11, %v3880_v61 }
 0x1be   : > { %3719 = vmatpush3.msk.msra.mxu1 %vm821_vm5, %v4559_v48  ;;  %3745 = vmatprep.mubr.msk.f32.mxu0 %vm3974_vm0, %v3973_v0 }
 0x1bf   : > { %3748 = vmatprep.subr.mxu0 %v3973_v0  ;;  %3720 = vmatprep.mubr.msk.f32.mxu1 %vm3974_vm0, %v3973_v0 }
 0x1c0   : > { %3723 = vmatprep.subr.mxu1 %v3973_v0  ;;  %3746 = vmatmul.mubr.msk.f32.vlgmr.msra.gmra.mxu0 %vm5274_vm12, %v3879_v17 }
 0x1c1   : > { %3749 = vmatpush3.msk.msra.mxu0 %vm821_vm5, %v4602_v52  ;;  %3721 = vmatmul.mubr.msk.f32.vlgmr.msra.gmra.mxu1 %vm5275_vm14, %v3881_v1 }
 0x1c2   : > { %3724 = vmatpush3.msk.msra.mxu1 %vm821_vm5, %v4559_v48  ;;  %3750 = vmatprep.mubr.msk.f32.mxu0 %vm3974_vm0, %v3973_v0  ;;  %v3169_v48 = vld [vmem:[%s5258_s4 + $0x78] sm:$0xff] }
 0x1c3   : > { %3753 = vmatprep.subr.mxu0 %v3973_v0  ;;  %3725 = vmatprep.mubr.msk.f32.mxu1 %vm3974_vm0, %v3973_v0 }
 0x1c4   : > { %3751 = vmatmul.mubr.msk.f32.vlgmr.msra.gmra.mxu0 %vm5276_vm15, %v3880_v61  ;;  %3758 = vmatprep.subr.mxu1 %v3973_v0 }
 0x1c5   : > { %3754 = vmatpush3.msk.msra.mxu0 %vm821_vm5, %v4602_v52  ;;  %3726 = vmatmul.mubr.msk.f32.vlgmr.msra.gmra.mxu1 %vm5277_vm13, %v3882_v45 }
 0x1c6   : > { %3759 = vmatpush3.msk.msra.mxu1 %vm821_vm5, %v4602_v52  ;;  %3755 = vmatprep.mubr.msk.f32.mxu0 %vm3974_vm0, %v3973_v0  ;;  %v3168_v52 = vld [vmem:[%s5258_s4 + $0x70] sm:$0xff] }
 0x1c7   : > { %3760 = vmatprep.mubr.msk.f32.mxu1 %vm3974_vm0, %v3973_v0  ;;  %3186 = vmatprep.subr.mxu0 %v3973_v0 }
 0x1c8   : > { %3756 = vmatmul.mubr.msk.f32.vlgmr.msra.gmra.mxu0 %vm5271_vm3, %v3881_v1  ;;  %v3982_v1 = vmov 1966171168  }
 0x1c9   : > { %3761 = vmatmul.mubr.msk.f32.vlgmr.msra.gmra.mxu1 %vm5278_vm8, %v3882_v45  ;;  %3187 = vmatpush1.msra.mxu0 %v3169_v48  ;;  %v3264_v45 = vunpack.c.l.s4 %v3982_v1 }
 0x1ca   : > { %3188 = vmatprep.subr.mxu0 %v3973_v0 }
 0x1cb   : > { %3189 = vmatpush1.msra.mxu0 %v3168_v52  ;;  %v3172_v52 = vld [vmem:[%s5258_s4 + $0x90] sm:$0xff] }
 0x1cc   : > { %3190 = vmatprep.subr.mxu0 %v3973_v0 }
 0x1cd   : > { %3191 = vmatpush1.msra.mxu0 %v3167_v2 }
 0x1ce   : > { %3192 = vmatprep.subr.mxu0 %v3973_v0 }
 0x1cf   : > { %3193 = vmatpush1.msra.mxu0 %v3166_v44 }
 0x1d0   : > { %3194 = vmatprep.subr.mxu0 %v3973_v0 }
 0x1d1   : > { %3195 = vmatpush1.msra.mxu0 %v3165_v3  ;;  %v3171_v3 = vld [vmem:[%s5258_s4 + $0x88] sm:$0xff] }
 0x1d2   : > { %3196 = vmatprep.subr.mxu0 %v3973_v0 }
 0x1d3   : > { %3197 = vmatpush1.msra.mxu0 %v3164_v4 }
 0x1d4   : > { %3198 = vmatprep.subr.mxu0 %v3973_v0 }
 0x1d5   : > { %3199 = vmatpush1.msra.mxu0 %v3163_v59 }
 0x1d6   : > { %3200 = vmatprep.subr.mxu0 %v3973_v0 }
 0x1d7   : > { %3201 = vmatpush1.msra.mxu0 %v3162_v60 }
 0x1d8   : > { %3202 = vmatprep.subr.mxu0 %v3973_v0 }
 0x1d9   : > { %3203 = vmatpush1.msra.mxu0 %v3161_v6  ;;  %v3170_v6 = vld [vmem:[%s5258_s4 + $0x80] sm:$0xff] }
 0x1da   : > { %3204 = vmatprep.subr.mxu0 %v3973_v0 }
 0x1db   : > { %3205 = vmatpush1.msra.mxu0 %v3160_v35  ;;  %v3265_v35 = vunpack.c.0.s8 %v3264_v45 }
 0x1dc   : > { %3206 = vmatprep.subr.mxu0 %v3973_v0 }
 0x1dd   : > { %3207 = vmatpush1.msra.mxu0 %v3159_v18 }
 0x1de   : > { %3208 = vmatprep.subr.mxu0 %v3973_v0 }
 0x1df   : > { %3209 = vmatpush1.msra.mxu0 %v3158_v21 }
 0x1e0   : > { %3210 = vmatprep.subr.mxu0 %v3973_v0 }
 0x1e1   : > { %3211 = vmatpush1.msra.mxu0 %v3157_v22 }
 0x1e2   : > { %3212 = vmatprep.subr.mxu0 %v3973_v0 }
 0x1e3   : > { %3213 = vmatpush1.msra.mxu0 %v3156_v26 }
 0x1e4   : > { %3214 = vmatprep.subr.mxu0 %v3973_v0 }
 0x1e5   : > { %3215 = vmatpush1.msra.mxu0 %v3155_v28 }
 0x1e6   : > { %3216 = vmatprep.subr.mxu0 %v3973_v0 }
 0x1e7   : > { %3217 = vmatpush1.msra.mxu0 %v3154_v50 }
 0x1e8   : > { %3226 = vmatprep.subr.mxu0 %v3973_v0 }
 0x1e9   : > { %3227 = vmatpush2.msra.mxu0 %v3181_v34 }
 0x1ea   : > { %3228 = vmatprep.subr.mxu0 %v3973_v0 }
 0x1eb   : > { %3229 = vmatpush2.msra.mxu0 %v3180_v55 }
 0x1ec   : > { %3230 = vmatprep.subr.mxu0 %v3973_v0 }
 0x1ed   : > { %3231 = vmatpush2.msra.mxu0 %v3179_v56 }
 0x1ee   : > { %3232 = vmatprep.subr.mxu0 %v3973_v0 }
 0x1ef   : > { %3233 = vmatpush2.msra.mxu0 %v3178_v53 }
 0x1f0   : > { %3234 = vmatprep.subr.mxu0 %v3973_v0 }
 0x1f1   : > { %3235 = vmatpush2.msra.mxu0 %v3177_v40 }
 0x1f2   : > { %3236 = vmatprep.subr.mxu0 %v3973_v0 }
 0x1f3   : > { %3237 = vmatpush2.msra.mxu0 %v3176_v63 }
 0x1f4   : > { %3238 = vmatprep.subr.mxu0 %v3973_v0 }
 0x1f5   : > { %3239 = vmatpush2.msra.mxu0 %v3175_v10 }
 0x1f6   : > { %3240 = vmatprep.subr.mxu0 %v3973_v0 }
 0x1f7   : > { %3241 = vmatpush2.msra.mxu0 %v3174_v14 }
 0x1f8   : > { %3242 = vmatprep.subr.mxu0 %v3973_v0 }
 0x1f9   : > { %3243 = vmatpush2.msra.mxu0 %v3173_v46 }
 0x1fa   : > { %3244 = vmatprep.subr.mxu0 %v3973_v0 }
 0x1fb   : > { %3245 = vmatpush2.msra.mxu0 %v3172_v52 }
 0x1fc   : > { %3246 = vmatprep.subr.mxu0 %v3973_v0 }
 0x1fd   : > { %3247 = vmatpush2.msra.mxu0 %v3171_v3 }
 0x1fe   : > { %3248 = vmatprep.subr.mxu0 %v3973_v0  ;;  %v3289_v0 = vsub.s32 0, %v4221_v37 }
 0x1ff   : > { %3249 = vmatpush2.msra.mxu0 %v3170_v6 }
 0x254   : > { %v784_v23 = vpop.f32.mrf.mxu0 }
 0x255   : > { %v785_v42 = vadd.f32 %v784_v23, %v711_v25 }
 0x256   : > { %v786_v24 = vpop.f32.mrf.mxu0 }
 0x257   : > { %v3490_v41 = vmul.f32 -1.442695, %v785_v42  ;;  %v3268_v24 = vsub.s32 %v3265_v35, %v4221_v37 }
 0x269   : > { %v2001_v38 = vpop.f32.mrf.mxu1 }
 0x26a   : > { %v2002_v30 = vadd.f32 %v2001_v38, %v1931_v31 }
 0x26b   : > { %v2003_v33 = vpop.f32.mrf.mxu1 }
 0x26c   : > { %v3528_v47 = vmul.f32 -1.442695, %v2002_v30 }
 0x26d   : > { %v5063_v49 = vpop.f32.mrf.mxu1 }
 0x26e   : > { %3860 = vpow2.f32 %v3528_v47 }
 0x26f   : > { %v3697_v51 = vpop.f32.mrf.mxu1  ;;  %3862 = vpow2.f32 %v3490_v41 }
 0x270   : > { %v789_v54 = vpop.f32.mrf.mxu0 }
 0x271   : > { %v790_v57 = vadd.f32 %v789_v54, %v711_v25  ;;  %v5073_v7 = vpop.f32.mrf.mxu1 }
 0x272   : > { %v791_v29 = vpop.f32.mrf.mxu0 }
 0x273   : > { %v3491_v5 = vmul.f32 -1.442695, %v790_v57  ;;  %v3702_v58 = vpop.f32.mrf.mxu1 }
 0x274   : > { %v5076_v36 = vpop.f32.mrf.mxu0 }
 0x275   : > { %3864 = vpow2.f32 %v3491_v5  ;;  %v2271_v9 = vpop.f32.mrf.mxu1 }
 0x276   : > { %3099 = vrot.lane.b32.xlu0 %v2271_v9, %s3977_s28  ;;  %v3732_v32 = vpop.f32.mrf.mxu0 }
 0x277   : > { %v3707_v39 = vpop.f32.mrf.mxu1 }
 0x278   : > { %v5087_v62 = vpop.f32.mrf.mxu0 }
 0x279   : > { %v2341_v12 = vpop.f32.mrf.mxu1 }
 0x27a   : > { %3103 = vrot.lane.b32.xlu0 %v2341_v12, %s3976_s26  ;;  %v3737_v27 = vpop.f32.mrf.mxu0 }
 0x27b   : > { %v3861_v13 = vpop.eup %3860  ;;  %v3712_v8 = vpop.f32.mrf.mxu1 }
 0x27c   : > { %v2008_v11 = vadd.f32 1.0, %v3861_v13  ;;  %v2810_v15 = vpop.f32.mrf.mxu0  ;;  %v3863_v19 = vpop.eup %3862 }
 0x27d   : > { %v2411_v20 = vpop.f32.mrf.mxu1  ;;  %3123 = vrot.lane.b32.xlu1 %v2810_v15, %s3975_s20  ;;  %v799_v17 = vadd.f32 1.0, %v3863_v19 }
 0x27e   : > { %3866 = vrcp.f32 %v2008_v11  ;;  %3107 = vrot.lane.b32.xlu0 %v2411_v20, %s3978_s29  ;;  %v3742_v16 = vpop.f32.mrf.mxu0 }
 0x27f   : > { %v3717_v43 = vpop.f32.mrf.mxu1  ;;  %3868 = vrcp.f32 %v799_v17 }
 0x280   : > { %v2880_v61 = vpop.f32.mrf.mxu0 }
 0x281   : > { %v2481_v48 = vpop.f32.mrf.mxu1  ;;  %3127 = vrot.lane.b32.xlu1 %v2880_v61, %s3977_s28  ;;  %s3910_s28 = sshll.u32 %s3983_s17, 4  ;;  %s3911_s28 = int_to_ptr.vmem [resolvable:$false] %s3910_s28 }
 0x282   : > { %v3865_v2 = vpop.eup %3864  ;;  %3111 = vrot.lane.b32.xlu0 %v2481_v48, %s3979_s9  ;;  %v3747_v44 = vpop.f32.mrf.mxu0  ;;  %s3912_s10 = scalar_lea.vmem %s3911_s28, 2048 }
 0x283   : > { %v800_v4 = vadd.f32 1.0, %v3865_v2  ;;  %v3722_v59 = vpop.f32.mrf.mxu1 }
 0x284   : > { %v2950_v60 = vpop.f32.mrf.mxu0 }
 0x285   : > { %3870 = vrcp.f32 %v800_v4  ;;  %v2551_v18 = vpop.f32.mrf.mxu1  ;;  %3131 = vrot.lane.b32.xlu1 %v2950_v60, %s3976_s26  ;;  %s256_s26 = sand.u32 1, %s3962_s22  }
 0x286   : > { %3115 = vrot.lane.b32.xlu0 %v2551_v18, %s3980_s18  ;;  %v3752_v21 = vpop.f32.mrf.mxu0  ;;  %v3328_v18 = vsub.s32 1, %v4221_v37  ;;  %s3566_s18 = sshll.u32 %s4042_s25, 10  ;;  %s5214_s25 = scalar_lea.sflag [#allocation3], %s256_s26 }
 0x287   : > { %v3727_v22 = vpop.f32.mrf.mxu1  ;;  %s5202_s14 = scalar_lea.hbm %s5260_s6, %s3566_s18 }
 0x288   : > { %v3020_v23 = vpop.f32.mrf.mxu0  ;;  %v3339_v22 = vsub.s32 2, %v4221_v37 }
 0x289   : > { %3095 = vrot.lane.b32.xlu1 %v5073_v7, %s3975_s20  ;;  %v3090_v25 = vpop.f32.mrf.mxu1  ;;  %s3529_s20 = sld [smem:[#allocation2 + $0x2]] }
 0x28a   : > { %3119 = vrot.lane.b32.xlu0 %v5076_v36, %s5279_s11  ;;  %v3757_v31 = vpop.f32.mrf.mxu0 }
 0x28b   : > { %v3867_v42 = vpop.eup %3866  ;;  %v3762_v26 = vpop.f32.mrf.mxu1 }
 0x28c   : > { %v3269_v28 = vrot.slane %v3867_v42, %v3268_v24  ;;  %v3869_v50 = vpop.eup %3868 }
 0x28d   : > { %3135 = vrot.lane.b32.xlu1 %v3020_v23, %s3978_s29  ;;  %s3485_s29 = sshll.u32 %s256_s26, 6 }
 0x28e   : > { %v3277_v38 = vrot.slane %v3269_v28, %v3268_v24  ;;  %v3270_v30 = vcombine.high %v3269_v28, %v3269_v28 }
 0x290   : > { %v3290_v33 = vrot.slane %v3277_v38, %v3289_v0  ;;  %v3284_v41 = vrot.slane %v3270_v30, %v3268_v24  ;;  %v3285_v47 = vcombine.high %v3277_v38, %v3277_v38  ;;  %v3350_v24 = vsub.s32 3, %v4221_v37 }
 0x291   : > { %3139 = vrot.lane.b32.xlu1 %v3090_v25, %s3979_s9  ;;  %s5175_s9 = scalar_lea.vmem [#allocation5], %s3485_s29 }
 0x292   : > { %v3871_v34 = vpop.eup %3870  ;;  %v5132_v51 = vadd.f32 %v3869_v50, %v3290_v33  ;;  %v3294_v54 = vrot.slane %v3284_v41, %v3289_v0  ;;  %v3298_v55 = vrot.slane %v3285_v47, %v3289_v0  ;;  %v3286_v56 = vcombine.high %v3284_v41, %v3284_v41  ;;  %v3884_v47 = vld [vmem:[%s4096_s19] sm:$0xff]  ;;  %s3405_s12 = sshll.u32 %s5175_s9, 4  ;;  %s5204_s12 = int_to_ptr.vmem [resolvable:$true] %s3405_s12 }
 0x293   : > { %v5134_v57 = vadd.f32 %v3871_v34, %v3290_v33  ;;  %v3883_v33 = vld [vmem:[%s4096_s19 + $0x8] sm:$0xff]  ;;  %s3906_s16 = scalar_lea.vmem %s5204_s12, 1024  ;;  %p3913_p13 = scmp.lt.s32.totalorder %s5204_s12, %s3911_s28 }
 0x294   : > { %v5136_v7 = vadd.f32 %v3871_v34, %v3294_v54  ;;  %v5138_v29 = vadd.f32 %v3869_v50, %v3294_v54  ;;  %v5140_v5 = vadd.f32 %v3871_v34, %v3298_v55  ;;  %v5142_v58 = vadd.f32 %v3869_v50, %v3298_v55  ;;  %p3907_p9 = scmp.ne.s32.totalorder %s5204_s12, %s3906_s16  ;;  %p3914_p0 = scmp.lt.s32.totalorder %s3912_s10, %s3906_s16 }
 0x295   : > { %v3302_v36 = vrot.slane %v3286_v56, %v3289_v0 }
 0x296   : > { %p3908_p10 = pnand %p3907_p9, %p4059_p5  ;;  %p3915_p1 = por %p3914_p0, %p3913_p13 }
 0x297   : > { %v5144_v53 = vadd.f32 %v3871_v34, %v3302_v36  ;;  %v5146_v40 = vadd.f32 %v3869_v50, %v3302_v36  ;;  %v3885_v36 = vld [vmem:[%s4096_s19 + $0x18] sm:$0xff] }
 0x298   : > { %p3909_p12 = pneg %p3908_p10 }
 0x29a   : > { %p3916_p2 = pnand %p3915_p1, %p3909_p12 }
 0x2e8   : > { %v3100_v9 = vpop.permute.xlu0 %3099 }
 0x2ec   : > { %v3104_v32 = vpop.permute.xlu0 %3103 }
 0x2ef   : > { %v3124_v39 = vpop.permute.xlu1 %3123 }
 0x2f0   : > { %v3108_v63 = vpop.permute.xlu0 %3107  ;;  %v3149_v16 = vsel %vm272_vm1, %v5087_v62, %v3124_v39  ;;  %v3182_v62 = vstv %s3529_s20 }
 0x2f3   : > { %v3128_v10 = vpop.permute.xlu1 %3127 }
 0x2f4   : > { %v3112_v27 = vpop.permute.xlu0 %3111  ;;  %v3150_v46 = vsel %vm655_vm2, %v3149_v16, %v3128_v10 }
 0x2f7   : > { %v3132_v12 = vpop.permute.xlu1 %3131 }
 0x2f8   : > { %v3116_v15 = vpop.permute.xlu0 %3115  ;;  %v3151_v17 = vsel %vm658_vm4, %v3150_v46, %v3132_v12 }
 0x2fb   : > { %v3096_v13 = vpop.permute.xlu1 %3095 }
 0x2fc   : > { %v3142_v8 = vsel %vm272_vm1, %v5063_v49, %v3096_v13  ;;  %v3120_v45 = vpop.permute.xlu0 %3119  ;;  %v3887_v13 = vld [vmem:[%s4096_s19 + $0x28] sm:$0xff] }
 0x2fd   : > { %v3143_v11 = vsel %vm655_vm2, %v3142_v8, %v3100_v9  ;;  %v3886_v9 = vld [vmem:[%s4096_s19 + $0x10] sm:$0xff] }
 0x2fe   : > { %v3144_v19 = vsel %vm658_vm4, %v3143_v11, %v3104_v32  ;;  %v3888_v11 = vld [vmem:[%s4096_s19 + $0x20] sm:$0xff] }
 0x2ff   : > { %v3145_v20 = vsel %vm661_vm7, %v3144_v19, %v3108_v63  ;;  %v3136_v14 = vpop.permute.xlu1 %3135 }
 0x300   : > { %v3146_v43 = vsel %vm664_vm10, %v3145_v20, %v3112_v27  ;;  %v3152_v49 = vsel %vm661_vm7, %v3151_v17, %v3136_v14  ;;  %v3890_v14 = vld [vmem:[%s4096_s19 + $0x30] sm:$0xff] }
 0x301   : > { %v3147_v61 = vsel %vm667_vm6, %v3146_v43, %v3116_v15 }
 0x302   : > { %v3148_v52 = vsel %vm670_vm9, %v3147_v61, %v3120_v45 }
 0x303   : > { %v3140_v1 = vpop.permute.xlu1 %3139 }
 0x304   : > { %v3153_v48 = vsel %vm664_vm10, %v3152_v49, %v3140_v1 }
 0x305   : > { %3558 = vmatprep.mubr.msk.f32.mxu0 %vm667_vm6, %v3153_v48 }
 0x306   : > { %3251 = vmatmul.mubr.f32.vlgmr.msra.gmra.mxu0 %v3148_v52 }
 0x3c6   : > { %v3252_v2 = vpop.f32.mrf.mxu0 }
 0x3c7   : > { %v3253_v44 = vadd.f32 %v3252_v2, %v3182_v62 }
 0x3c8   : > { %v3254_v3 = vpop.f32.mrf.mxu0 }
 0x3c9   : > { %v3559_v4 = vmul.f32 -1.442695, %v3253_v44 }
 0x3cb   : > { %3872 = vpow2.f32 %v3559_v4 }
 0x3d8   : > { %v3873_v59 = vpop.eup %3872 }
 0x3d9   : > { %v3259_v60 = vadd.f32 1.0, %v3873_v59 }
 0x3db   : > { %3874 = vrcp.f32 %v3259_v60 }
 0x3e8   : > { %v3875_v6 = vpop.eup %3874 }
 0x3e9   : > { %v3318_v35 = vrot.slane %v3875_v6, %v3289_v0  ;;  %v3329_v21 = vrot.slane %v3875_v6, %v3328_v18  ;;  %v3340_v23 = vrot.slane %v3875_v6, %v3339_v22  ;;  %v3351_v25 = vrot.slane %v3875_v6, %v3350_v24 }
 0x3eb   : > { %3324 = vbcast.lane.b32.xlu0 %v3318_v35, 264  ;;  %3320 = vbcast.lane.b32.xlu1 %v3318_v35, 256 }
 0x3ef   : > { %3335 = vbcast.lane.b32.xlu0 %v3329_v21, 264  ;;  %3331 = vbcast.lane.b32.xlu1 %v3329_v21, 256 }
 0x3f3   : > { %3346 = vbcast.lane.b32.xlu0 %v3340_v23, 264  ;;  %3342 = vbcast.lane.b32.xlu1 %v3340_v23, 256 }
 0x3f7   : > { %3357 = vbcast.lane.b32.xlu0 %v3351_v25, 264  ;;  %3353 = vbcast.lane.b32.xlu1 %v3351_v25, 256 }
 0x45d   : > { %v3325_v31 = vpop.permute.xlu0 %3324  ;;  %v3321_v42 = vpop.permute.xlu1 %3320 }
 0x45e   : > { %v3360_v26 = vadd.f32 %v3325_v31, %v5134_v57  ;;  %v3359_v0 = vadd.f32 %v3321_v42, %v5132_v51 }
 0x460   : > { %v3368_v28 = vmul.f32 0.33333334, %v3360_v26  ;;  %v3367_v38 = vmul.f32 0.33333334, %v3359_v0 }
 0x461   : > { %v3336_v37 = vpop.permute.xlu0 %3335  ;;  %v3332_v30 = vpop.permute.xlu1 %3331 }
 0x462   : > { %v3376_v41 = vmul.f32 %v3883_v33, %v3368_v28  ;;  %v3375_v50 = vmul.f32 %v3884_v47, %v3367_v38  ;;  %v3362_v34 = vadd.f32 %v3336_v37, %v5136_v7  ;;  %v3361_v54 = vadd.f32 %v3332_v30, %v5138_v29 }
 0x464   : > { %3384 = vst.msk [vmem:[%s5175_s9 + $0x8] sm:$0xff] %vm272_vm1, %v3376_v41  ;;  %3383 = vst.msk [vmem:[%s5175_s9] sm:$0xff] %vm272_vm1, %v3375_v50  ;;  %v3370_v51 = vmul.f32 0.33333334, %v3362_v34  ;;  %v3369_v55 = vmul.f32 0.33333334, %v3361_v54 }
 0x465   : > { %v3347_v56 = vpop.permute.xlu0 %3346  ;;  %v3343_v57 = vpop.permute.xlu1 %3342 }
 0x466   : > { %v3378_v7 = vmul.f32 %v3885_v36, %v3370_v51  ;;  %v3377_v29 = vmul.f32 %v3886_v9, %v3369_v55  ;;  %v3364_v32 = vadd.f32 %v3347_v56, %v5140_v5  ;;  %v3363_v39 = vadd.f32 %v3343_v57, %v5142_v58 }
 0x468   : > { %3386 = vst.msk [vmem:[%s5175_s9 + $0x18] sm:$0xff] %vm272_vm1, %v3378_v7  ;;  %3385 = vst.msk [vmem:[%s5175_s9 + $0x10] sm:$0xff] %vm272_vm1, %v3377_v29  ;;  %v3372_v63 = vmul.f32 0.33333334, %v3364_v32  ;;  %v3371_v10 = vmul.f32 0.33333334, %v3363_v39 }
 0x469   : > { %v3358_v12 = vpop.permute.xlu0 %3357  ;;  %v3354_v27 = vpop.permute.xlu1 %3353 }
 0x46a   : > { %v3380_v8 = vmul.f32 %v3887_v13, %v3372_v63  ;;  %v3379_v15 = vmul.f32 %v3888_v11, %v3371_v10  ;;  %v3366_v5 = vadd.f32 %v3358_v12, %v5144_v53  ;;  %v3365_v58 = vadd.f32 %v3354_v27, %v5146_v40  ;;  %v3889_v53 = vld [vmem:[%s4096_s19 + $0x38] sm:$0xff] }
 0x46c   : > { %3388 = vst.msk [vmem:[%s5175_s9 + $0x28] sm:$0xff] %vm272_vm1, %v3380_v8  ;;  %3387 = vst.msk [vmem:[%s5175_s9 + $0x20] sm:$0xff] %vm272_vm1, %v3379_v15  ;;  %v3374_v19 = vmul.f32 0.33333334, %v3366_v5  ;;  %v3373_v20 = vmul.f32 0.33333334, %v3365_v58 }
 0x46e   : > { %v3382_v40 = vmul.f32 %v3889_v53, %v3374_v19  ;;  %v3381_v16 = vmul.f32 %v3890_v14, %v3373_v20 }
 0x470   : > { %3390 = vst.msk [vmem:[%s5175_s9 + $0x38] sm:$0xff] %vm272_vm1, %v3382_v40  ;;  %3389 = vst.msk [vmem:[%s5175_s9 + $0x30] sm:$0xff] %vm272_vm1, %v3381_v16 }
 0x471   : > { %3919 = shalt.err (!%p3916_p2)
}
 0x472   : > { %s3920_s19 = scalar_lea.hbm %s5202_s14, 1024  ;;  %s3924_s26 = scalar_lea.hbm %s5260_s6, 2048 }
 0x473   : > { %p3921_p3 = scmp.ne.s32.totalorder %s5202_s14, %s3920_s19  ;;  %p3925_p8 = scmp.lt.s32.totalorder %s5202_s14, %s5260_s6 }
 0x474   : > { %p3926_p11 = scmp.lt.s32.totalorder %s3924_s26, %s3920_s19 }
 0x475   : > { %p3922_p4 = pnand %p3921_p3, %p4059_p5 }
 0x476   : > { %p3927_p9 = por %p3926_p11, %p3925_p8 }
 0x477   : > { %p3923_p7 = pneg %p3922_p4 }
 0x479   : > { %p3928_p10 = pnand %p3927_p9, %p3923_p7 }
 0x47b   : > { %3931 = shalt.err (!%p3928_p10)
}
 0x47c   : > { %s3984_s18 = smov 128   ;;  %s3985_s13 = smov 8  }
 0x47d   : > { %3767 = dma.vmem_to_hbm [thread:$0]  (%p4059_p5), %s5204_s12, 1024, %s5202_s14, %s5214_s25, %s3984_s18, %s3984_s18, %s3985_s13  }
 0x47e PF: > { %p3779_p12 = scmp.ge.s32.totalorder %s3970_s24, 2  ;;  %s3420_s15 = sand.u32 1, %s3958_s21  }
 0x47f   : > { %s3421_s16 = scalar_lea.sflag [#allocation3], %s3420_s15 }
 0x480   : > { %p3774_p13 = pnand %p3779_p12, %p4063_p6 }
 0x482   : > { %p3775_p0 = pneg %p3774_p13 }
 0x484   : > { %3953 = dma.done.wait (%p3775_p0), %s3421_s16, 1024  }
 0x485   : > { %3955 = vsyncadd (%p3775_p0), %s3421_s16, 4294966272  ;;  %p17_p1 = scmp.ge.s32.totalorder %s4046_s27, 4   ;;  %s5280_s21 = smov %s3962_s22 }
 0x486   : > { %s5281_s22 = smov %s3966_s23  ;;  %s5282_s23 = smov %s4057_s30 }
 0x487   : > { %s5283_s24 = smov %s4046_s27  ;;  %19 = sbr.rel (!%p17_p1) target bundleno = 4 (0x4), region = 90 }
 0x48c   :  { %3426 = vsyncpa [#allocation3], 1 }
 0x48d   :  { %3428 = vsyncpa [#allocation3 + $0x1], 1 }
 0x48e   :  { %3429 = vsyncpa [#allocation4], 1 }
 0x48f   :  { %3431 = vsyncpa [#allocation4 + $0x1], 1 }

</bundles_post_ra>
